<compile_context>
chip_gen: v7x
topology: tpu7x:2x2x1
jax: 0.10.0
libtpu: 0.0.40
codegen_flags: <defaults>
</compile_context>

<pallas_src>
import jax
import jax.numpy as jnp
import numpy as np
from jax import lax
from jax.experimental import pallas as pl
from jax.experimental.pallas import tpu as pltpu

MIX_CHANNELS = 8          # C
NUM_LEAD = 4              # lead_channels (module default)
_LANE = 128
_CHUNK_SUBLANES = 32      # 32 x 128 = 4096 elements per channel per inner chunk


def _round_up(v, m):
    return (v + m - 1) // m * m


def _make_kernel(C, L, S, chunk):
    """Build the kernel for C channels, L lead channels, S-sublane blocks."""
    n_chunks = S // chunk

    def kernel(x_ref, mix_ref, leadw_ref, leadb_ref, bodyw_ref, bodyb_ref,
               ybar_ref, mixout_ref):
        # x_ref / mix_ref / ybar_ref / mixout_ref : (C, S, 128) VMEM tiles
        # leadw_ref : (L-1, L-1) SMEM (row i = lead_module[i] weights, zero pad)
        # leadb_ref : (L-1,)     SMEM
        # bodyw_ref : (C-L, L)   SMEM
        # bodyb_ref : (C-L,)     SMEM

        # Hoist the tiny scalar parameters out of the chunk loop (sreg reads).
        lead_w = [[leadw_ref[i, c] for c in range(i + 1)] for i in range(L - 1)]
        lead_b = [leadb_ref[i] for i in range(L - 1)]
        body_w = [[bodyw_ref[o, c] for c in range(L)] for o in range(C - L)]
        body_b = [bodyb_ref[o] for o in range(C - L)]

        def quant(v, mu):
            return jnp.round(v - mu) + mu

        def chunk_body(ci, carry):
            s0 = pl.multiple_of(ci * chunk, chunk)
            sl = pl.ds(s0, chunk)

            # ---- channel 0: mix passes through unchanged ----
            m0 = mix_ref[0, sl, :]
            y0 = quant(x_ref[0, sl, :], m0)
            mixout_ref[0, sl, :] = m0
            ybar_ref[0, sl, :] = y0
            y_rows = [y0]

            # ---- lead channels 1 .. L-1: tiny 1x1 convs as VPU FMAs ----
            for idx in range(1, L):
                mc = mix_ref[idx, sl, :] + lead_b[idx - 1]
                for c in range(idx):
                    mc = mc + lead_w[idx - 1][c] * y_rows[c]
                y = quant(x_ref[idx, sl, :], mc)
                mixout_ref[idx, sl, :] = mc
                ybar_ref[idx, sl, :] = y
                y_rows.append(y)

            # ---- body: 1x1 conv L -> C-L as per-output-channel FMAs ----
            for o in range(C - L):
                k = L + o
                mc = mix_ref[k, sl, :] + body_b[o]
                for c in range(L):
                    mc = mc + body_w[o][c] * y_rows[c]
                mixout_ref[k, sl, :] = mc
                ybar_ref[k, sl, :] = quant(x_ref[k, sl, :], mc)
            return carry

        lax.fori_loop(0, n_chunks, chunk_body, 0, unroll=False)

    return kernel


def channel_deps_forward(x, mix, lead_w, lead_b, body_w, body_b, *,
                         tile_sublanes=256):
    """x, mix: NCHW float32. Returns (y_bar, mix_out) in NCHW."""
    N, C, H, W = x.shape
    L = lead_b.shape[0] + 1
    assert body_w.shape == (C - L, L)
    P = H * W

    # Pad the spatial extent once on the host to a multiple of 32*128 so every
    # tile is dense (no masked partial stores) and the chunk loop divides evenly.
    pad_unit = _CHUNK_SUBLANES * _LANE
    P_pad = _round_up(max(P, pad_unit), pad_unit)
    G = P_pad // _LANE                       # number of 128-lane groups

    def to_blocks(a):
        a = a.reshape(N, C, P)
        if P_pad != P:
            a = jnp.pad(a, ((0, 0), (0, 0), (0, P_pad - P)))
        return a.reshape(N, C, G, _LANE)

    x4 = to_blocks(x.astype(jnp.float32))
    mix4 = to_blocks(mix.astype(jnp.float32))

    # Sublane tile: big enough to amortize the ~0.35 us per-grid-step cost,
    # small enough to double-buffer the 4 streams comfortably in VMEM.
    S = min(_round_up(min(int(tile_sublanes), G), _CHUNK_SUBLANES), G)
    S = max(S, _CHUNK_SUBLANES)
    # Keep >= 2 grid steps so both v7x TensorCores get work.
    if N * pl.cdiv(G, S) < 2 and G > _CHUNK_SUBLANES:
        S = _round_up(pl.cdiv(G, 2), _CHUNK_SUBLANES)
    grid = (N, pl.cdiv(G, S))

    tile_spec = pl.BlockSpec((pl.Squeezed(), C, S, _LANE),
                             lambda n, p: (n, 0, p, 0))
    smem_spec = pl.BlockSpec(memory_space=pltpu.MemorySpace.SMEM)

    kernel = _make_kernel(C, L, S, _CHUNK_SUBLANES)

    ybar4, mixout4 = pl.pallas_call(
        kernel,
        out_shape=(jax.ShapeDtypeStruct((N, C, G, _LANE), jnp.float32),
                   jax.ShapeDtypeStruct((N, C, G, _LANE), jnp.float32)),
        grid_spec=pltpu.PrefetchScalarGridSpec(
            num_scalar_prefetch=0,
            grid=grid,
            in_specs=[tile_spec,    # x
                      tile_spec,    # mix
                      smem_spec,    # lead weights (padded square)
                      smem_spec,    # lead biases
                      smem_spec,    # body weights
                      smem_spec],   # body biases
            out_specs=[tile_spec, tile_spec]),
        compiler_params=pltpu.CompilerParams(
            dimension_semantics=("parallel", "parallel"),
            # 4 streams x 2 buffers x C x S x 128 x 4B = 8 MiB at S=256.
            vmem_limit_bytes=32 * 1024 * 1024),
    )(x4, mix4, lead_w, lead_b, body_w, body_b)

    def from_blocks(a4):
        return a4.reshape(N, C, P_pad)[:, :, :P].reshape(N, C, H, W)

    return from_blocks(ybar4), from_blocks(mixout4)


def reference_forward(x, mix, lead_w_list, lead_b, body_w, body_b):
    """Pure-JAX NCHW reference mirroring the PyTorch forward ('mixture', eval)."""
    C = x.shape[1]
    L = len(lead_w_list) + 1

    def quant(v, m):
        return jnp.round(v - m) + m

    mix_out = [mix[:, 0:1]]
    y_rows = [quant(x[:, 0:1], mix[:, 0:1])]
    for idx in range(1, L):
        mc = mix[:, idx:idx + 1] + lead_b[idx - 1]
        for c in range(idx):
            mc = mc + lead_w_list[idx - 1][c] * y_rows[c]
        y_rows.append(quant(x[:, idx:idx + 1], mc))
        mix_out.append(mc)
    for o in range(C - L):
        k = L + o
        mc = mix[:, k:k + 1] + body_b[o]
        for c in range(L):
            mc = mc + body_w[o, c] * y_rows[c]
        mix_out.append(mc)
        y_rows.append(quant(x[:, k:k + 1], mc))
    return (jnp.concatenate(y_rows, axis=1),
            jnp.concatenate(mix_out, axis=1))


if __name__ == "__main__":
    key = jax.random.PRNGKey(0)
    kx, kmix, kw = jax.random.split(key, 3)

    N, C, H, W = 2, MIX_CHANNELS, 16, 16
    x = jax.random.normal(kx, (N, C, H, W), jnp.float32) * 2.0
    mix = jax.random.normal(kmix, (N, C, H, W), jnp.float32) * 0.5

    # Deterministic parameter init (shapes from __init__: lead 1x1 convs + body 1x1 conv).
    keys = jax.random.split(kw, 2 * (NUM_LEAD - 1) + 2)
    lead_w_list, lead_b_vals = [], []
    lead_w_padded = np.zeros((NUM_LEAD - 1, NUM_LEAD - 1), np.float32)
    for i in range(NUM_LEAD - 1):
        w = jax.random.normal(keys[2 * i], (i + 1,), jnp.float32) * 0.1
        b = jax.random.normal(keys[2 * i + 1], (), jnp.float32) * 0.1
        lead_w_list.append(w)
        lead_b_vals.append(b)
        lead_w_padded[i, :i + 1] = np.asarray(w)
    lead_w = jnp.asarray(lead_w_padded)                       # (NUM_LEAD-1, NUM_LEAD-1)
    lead_b = jnp.stack(lead_b_vals)                           # (NUM_LEAD-1,)
    body_w = jax.random.normal(keys[-2], (C - NUM_LEAD, NUM_LEAD), jnp.float32) * 0.1
    body_b = jax.random.normal(keys[-1], (C - NUM_LEAD,), jnp.float32) * 0.1

    y_bar, mix_out = channel_deps_forward(x, mix, lead_w, lead_b, body_w, body_b)
    jax.block_until_ready((y_bar, mix_out))

    y_bar_ref, mix_out_ref = reference_forward(x, mix, lead_w_list, lead_b, body_w, body_b)
    assert np.allclose(np.asarray(mix_out), np.asarray(mix_out_ref), atol=1e-4), "mix_out mismatch"
    assert np.allclose(np.asarray(y_bar), np.asarray(y_bar_ref), atol=1e-4), "y_bar mismatch"

    print("KERNEL_OK")
</pallas_src>

<mosaic_0001>
module attributes {stable_mosaic.version = 11 : i64} {
  func.func @kernel(%arg0: i32, %arg1: i32, %arg2: memref<1x8x32x128xf32, #tpu.memory_space<vmem>>, %arg3: memref<1x8x32x128xf32, #tpu.memory_space<vmem>>, %arg4: memref<3x3xf32, #tpu.memory_space<smem>>, %arg5: memref<3xf32, #tpu.memory_space<smem>>, %arg6: memref<4x4xf32, #tpu.memory_space<smem>>, %arg7: memref<4xf32, #tpu.memory_space<smem>>, %arg8: memref<1x8x32x128xf32, #tpu.memory_space<vmem>>, %arg9: memref<1x8x32x128xf32, #tpu.memory_space<vmem>>) attributes {dimension_semantics = [#tpu.dimension_semantics<parallel>, #tpu.dimension_semantics<parallel>], iteration_bounds = array<i64: 2, 1>, scalar_prefetch = 0 : i64, scratch_operands = 0 : i64, tpu.core_type = #tpu.core_type<tc>, window_params = [{transform_indices = @transform_0, window_bounds = array<i64: 1, 8, 32, 128>}, {transform_indices = @transform_1, window_bounds = array<i64: 1, 8, 32, 128>}, {transform_indices = @transform_2, window_bounds = array<i64: 3, 3>}, {transform_indices = @transform_3, window_bounds = array<i64: 3>}, {transform_indices = @transform_4, window_bounds = array<i64: 4, 4>}, {transform_indices = @transform_5, window_bounds = array<i64: 4>}, {transform_indices = @transform_6, window_bounds = array<i64: 1, 8, 32, 128>}, {transform_indices = @transform_7, window_bounds = array<i64: 1, 8, 32, 128>}]} {
    %c0 = arith.constant 0 : index
    %c0_0 = arith.constant 0 : index
    %0 = memref.load %arg4[%c0, %c0_0] : memref<3x3xf32, #tpu.memory_space<smem>>
    %c1 = arith.constant 1 : index
    %c0_1 = arith.constant 0 : index
    %1 = memref.load %arg4[%c1, %c0_1] : memref<3x3xf32, #tpu.memory_space<smem>>
    %c1_2 = arith.constant 1 : index
    %c1_3 = arith.constant 1 : index
    %2 = memref.load %arg4[%c1_2, %c1_3] : memref<3x3xf32, #tpu.memory_space<smem>>
    %c2 = arith.constant 2 : index
    %c0_4 = arith.constant 0 : index
    %3 = memref.load %arg4[%c2, %c0_4] : memref<3x3xf32, #tpu.memory_space<smem>>
    %c2_5 = arith.constant 2 : index
    %c1_6 = arith.constant 1 : index
    %4 = memref.load %arg4[%c2_5, %c1_6] : memref<3x3xf32, #tpu.memory_space<smem>>
    %c2_7 = arith.constant 2 : index
    %c2_8 = arith.constant 2 : index
    %5 = memref.load %arg4[%c2_7, %c2_8] : memref<3x3xf32, #tpu.memory_space<smem>>
    %c0_9 = arith.constant 0 : index
    %6 = memref.load %arg5[%c0_9] : memref<3xf32, #tpu.memory_space<smem>>
    %c1_10 = arith.constant 1 : index
    %7 = memref.load %arg5[%c1_10] : memref<3xf32, #tpu.memory_space<smem>>
    %c2_11 = arith.constant 2 : index
    %8 = memref.load %arg5[%c2_11] : memref<3xf32, #tpu.memory_space<smem>>
    %c0_12 = arith.constant 0 : index
    %c0_13 = arith.constant 0 : index
    %9 = memref.load %arg6[%c0_12, %c0_13] : memref<4x4xf32, #tpu.memory_space<smem>>
    %c0_14 = arith.constant 0 : index
    %c1_15 = arith.constant 1 : index
    %10 = memref.load %arg6[%c0_14, %c1_15] : memref<4x4xf32, #tpu.memory_space<smem>>
    %c0_16 = arith.constant 0 : index
    %c2_17 = arith.constant 2 : index
    %11 = memref.load %arg6[%c0_16, %c2_17] : memref<4x4xf32, #tpu.memory_space<smem>>
    %c0_18 = arith.constant 0 : index
    %c3 = arith.constant 3 : index
    %12 = memref.load %arg6[%c0_18, %c3] : memref<4x4xf32, #tpu.memory_space<smem>>
    %c1_19 = arith.constant 1 : index
    %c0_20 = arith.constant 0 : index
    %13 = memref.load %arg6[%c1_19, %c0_20] : memref<4x4xf32, #tpu.memory_space<smem>>
    %c1_21 = arith.constant 1 : index
    %c1_22 = arith.constant 1 : index
    %14 = memref.load %arg6[%c1_21, %c1_22] : memref<4x4xf32, #tpu.memory_space<smem>>
    %c1_23 = arith.constant 1 : index
    %c2_24 = arith.constant 2 : index
    %15 = memref.load %arg6[%c1_23, %c2_24] : memref<4x4xf32, #tpu.memory_space<smem>>
    %c1_25 = arith.constant 1 : index
    %c3_26 = arith.constant 3 : index
    %16 = memref.load %arg6[%c1_25, %c3_26] : memref<4x4xf32, #tpu.memory_space<smem>>
    %c2_27 = arith.constant 2 : index
    %c0_28 = arith.constant 0 : index
    %17 = memref.load %arg6[%c2_27, %c0_28] : memref<4x4xf32, #tpu.memory_space<smem>>
    %c2_29 = arith.constant 2 : index
    %c1_30 = arith.constant 1 : index
    %18 = memref.load %arg6[%c2_29, %c1_30] : memref<4x4xf32, #tpu.memory_space<smem>>
    %c2_31 = arith.constant 2 : index
    %c2_32 = arith.constant 2 : index
    %19 = memref.load %arg6[%c2_31, %c2_32] : memref<4x4xf32, #tpu.memory_space<smem>>
    %c2_33 = arith.constant 2 : index
    %c3_34 = arith.constant 3 : index
    %20 = memref.load %arg6[%c2_33, %c3_34] : memref<4x4xf32, #tpu.memory_space<smem>>
    %c3_35 = arith.constant 3 : index
    %c0_36 = arith.constant 0 : index
    %21 = memref.load %arg6[%c3_35, %c0_36] : memref<4x4xf32, #tpu.memory_space<smem>>
    %c3_37 = arith.constant 3 : index
    %c1_38 = arith.constant 1 : index
    %22 = memref.load %arg6[%c3_37, %c1_38] : memref<4x4xf32, #tpu.memory_space<smem>>
    %c3_39 = arith.constant 3 : index
    %c2_40 = arith.constant 2 : index
    %23 = memref.load %arg6[%c3_39, %c2_40] : memref<4x4xf32, #tpu.memory_space<smem>>
    %c3_41 = arith.constant 3 : index
    %c3_42 = arith.constant 3 : index
    %24 = memref.load %arg6[%c3_41, %c3_42] : memref<4x4xf32, #tpu.memory_space<smem>>
    %c0_43 = arith.constant 0 : index
    %25 = memref.load %arg7[%c0_43] : memref<4xf32, #tpu.memory_space<smem>>
    %c1_44 = arith.constant 1 : index
    %26 = memref.load %arg7[%c1_44] : memref<4xf32, #tpu.memory_space<smem>>
    %c2_45 = arith.constant 2 : index
    %27 = memref.load %arg7[%c2_45] : memref<4xf32, #tpu.memory_space<smem>>
    %c3_46 = arith.constant 3 : index
    %28 = memref.load %arg7[%c3_46] : memref<4xf32, #tpu.memory_space<smem>>
    %c0_i32 = arith.constant 0 : i32
    %c32_i32 = arith.constant 32 : i32
    %29 = arith.muli %c0_i32, %c32_i32 : i32
    %30 = tpu.assume_multiple %29, 32 : i32
    %c0_47 = arith.constant 0 : index
    %c0_48 = arith.constant 0 : index
    %31 = arith.index_cast %30 : i32 to index
    %c0_49 = arith.constant 0 : index
    %32 = vector.load %arg3[%c0_47, %c0_48, %31, %c0_49] : memref<1x8x32x128xf32, #tpu.memory_space<vmem>>, vector<1x1x32x128xf32>
    %33 = vector.shape_cast %32 : vector<1x1x32x128xf32> to vector<32x128xf32>
    %c0_50 = arith.constant 0 : index
    %c0_51 = arith.constant 0 : index
    %34 = arith.index_cast %30 : i32 to index
    %c0_52 = arith.constant 0 : index
    %35 = vector.load %arg2[%c0_50, %c0_51, %34, %c0_52] : memref<1x8x32x128xf32, #tpu.memory_space<vmem>>, vector<1x1x32x128xf32>
    %36 = vector.shape_cast %35 : vector<1x1x32x128xf32> to vector<32x128xf32>
    %37 = arith.subf %36, %33 : vector<32x128xf32>
    %38 = math.roundeven %37 : vector<32x128xf32>
    %39 = arith.addf %38, %33 : vector<32x128xf32>
    %c0_53 = arith.constant 0 : index
    %c0_54 = arith.constant 0 : index
    %40 = arith.index_cast %30 : i32 to index
    %c0_55 = arith.constant 0 : index
    %41 = vector.load %arg9[%c0_53, %c0_54, %40, %c0_55] : memref<1x8x32x128xf32, #tpu.memory_space<vmem>>, vector<1x1x32x128xf32>
    %42 = vector.shape_cast %41 : vector<1x1x32x128xf32> to vector<32x128xf32>
    %43 = vector.shape_cast %33 : vector<32x128xf32> to vector<1x1x32x128xf32>
    tpu.vector_store %arg9[%c0_53, %c0_54, %40, %c0_55], %43 {strides = array<i32>} : memref<1x8x32x128xf32, #tpu.memory_space<vmem>>, vector<1x1x32x128xf32>,
    %c0_56 = arith.constant 0 : index
    %c0_57 = arith.constant 0 : index
    %44 = arith.index_cast %30 : i32 to index
    %c0_58 = arith.constant 0 : index
    %45 = vector.load %arg8[%c0_56, %c0_57, %44, %c0_58] : memref<1x8x32x128xf32, #tpu.memory_space<vmem>>, vector<1x1x32x128xf32>
    %46 = vector.shape_cast %45 : vector<1x1x32x128xf32> to vector<32x128xf32>
    %47 = vector.shape_cast %39 : vector<32x128xf32> to vector<1x1x32x128xf32>
    tpu.vector_store %arg8[%c0_56, %c0_57, %44, %c0_58], %47 {strides = array<i32>} : memref<1x8x32x128xf32, #tpu.memory_space<vmem>>, vector<1x1x32x128xf32>,
    %c0_59 = arith.constant 0 : index
    %c1_60 = arith.constant 1 : index
    %48 = arith.index_cast %30 : i32 to index
    %c0_61 = arith.constant 0 : index
    %49 = vector.load %arg3[%c0_59, %c1_60, %48, %c0_61] : memref<1x8x32x128xf32, #tpu.memory_space<vmem>>, vector<1x1x32x128xf32>
    %50 = vector.shape_cast %49 : vector<1x1x32x128xf32> to vector<32x128xf32>
    %51 = vector.broadcast %6 : f32 to vector<32x128xf32>
    %52 = arith.addf %50, %51 : vector<32x128xf32>
    %53 = vector.broadcast %0 : f32 to vector<32x128xf32>
    %54 = arith.mulf %53, %39 : vector<32x128xf32>
    %55 = arith.addf %52, %54 : vector<32x128xf32>
    %c0_62 = arith.constant 0 : index
    %c1_63 = arith.constant 1 : index
    %56 = arith.index_cast %30 : i32 to index
    %c0_64 = arith.constant 0 : index
    %57 = vector.load %arg2[%c0_62, %c1_63, %56, %c0_64] : memref<1x8x32x128xf32, #tpu.memory_space<vmem>>, vector<1x1x32x128xf32>
    %58 = vector.shape_cast %57 : vector<1x1x32x128xf32> to vector<32x128xf32>
    %59 = arith.subf %58, %55 : vector<32x128xf32>
    %60 = math.roundeven %59 : vector<32x128xf32>
    %61 = arith.addf %60, %55 : vector<32x128xf32>
    %c0_65 = arith.constant 0 : index
    %c1_66 = arith.constant 1 : index
    %62 = arith.index_cast %30 : i32 to index
    %c0_67 = arith.constant 0 : index
    %63 = vector.load %arg9[%c0_65, %c1_66, %62, %c0_67] : memref<1x8x32x128xf32, #tpu.memory_space<vmem>>, vector<1x1x32x128xf32>
    %64 = vector.shape_cast %63 : vector<1x1x32x128xf32> to vector<32x128xf32>
    %65 = vector.shape_cast %55 : vector<32x128xf32> to vector<1x1x32x128xf32>
    tpu.vector_store %arg9[%c0_65, %c1_66, %62, %c0_67], %65 {strides = array<i32>} : memref<1x8x32x128xf32, #tpu.memory_space<vmem>>, vector<1x1x32x128xf32>,
    %c0_68 = arith.constant 0 : index
    %c1_69 = arith.constant 1 : index
    %66 = arith.index_cast %30 : i32 to index
    %c0_70 = arith.constant 0 : index
    %67 = vector.load %arg8[%c0_68, %c1_69, %66, %c0_70] : memref<1x8x32x128xf32, #tpu.memory_space<vmem>>, vector<1x1x32x128xf32>
    %68 = vector.shape_cast %67 : vector<1x1x32x128xf32> to vector<32x128xf32>
    %69 = vector.shape_cast %61 : vector<32x128xf32> to vector<1x1x32x128xf32>
    tpu.vector_store %arg8[%c0_68, %c1_69, %66, %c0_70], %69 {strides = array<i32>} : memref<1x8x32x128xf32, #tpu.memory_space<vmem>>, vector<1x1x32x128xf32>,
    %c0_71 = arith.constant 0 : index
    %c2_72 = arith.constant 2 : index
    %70 = arith.index_cast %30 : i32 to index
    %c0_73 = arith.constant 0 : index
    %71 = vector.load %arg3[%c0_71, %c2_72, %70, %c0_73] : memref<1x8x32x128xf32, #tpu.memory_space<vmem>>, vector<1x1x32x128xf32>
    %72 = vector.shape_cast %71 : vector<1x1x32x128xf32> to vector<32x128xf32>
    %73 = vector.broadcast %7 : f32 to vector<32x128xf32>
    %74 = arith.addf %72, %73 : vector<32x128xf32>
    %75 = vector.broadcast %1 : f32 to vector<32x128xf32>
    %76 = arith.mulf %75, %39 : vector<32x128xf32>
    %77 = arith.addf %74, %76 : vector<32x128xf32>
    %78 = vector.broadcast %2 : f32 to vector<32x128xf32>
    %79 = arith.mulf %78, %61 : vector<32x128xf32>
    %80 = arith.addf %77, %79 : vector<32x128xf32>
    %c0_74 = arith.constant 0 : index
    %c2_75 = arith.constant 2 : index
    %81 = arith.index_cast %30 : i32 to index
    %c0_76 = arith.constant 0 : index
    %82 = vector.load %arg2[%c0_74, %c2_75, %81, %c0_76] : memref<1x8x32x128xf32, #tpu.memory_space<vmem>>, vector<1x1x32x128xf32>
    %83 = vector.shape_cast %82 : vector<1x1x32x128xf32> to vector<32x128xf32>
    %84 = arith.subf %83, %80 : vector<32x128xf32>
    %85 = math.roundeven %84 : vector<32x128xf32>
    %86 = arith.addf %85, %80 : vector<32x128xf32>
    %c0_77 = arith.constant 0 : index
    %c2_78 = arith.constant 2 : index
    %87 = arith.index_cast %30 : i32 to index
    %c0_79 = arith.constant 0 : index
    %88 = vector.load %arg9[%c0_77, %c2_78, %87, %c0_79] : memref<1x8x32x128xf32, #tpu.memory_space<vmem>>, vector<1x1x32x128xf32>
    %89 = vector.shape_cast %88 : vector<1x1x32x128xf32> to vector<32x128xf32>
    %90 = vector.shape_cast %80 : vector<32x128xf32> to vector<1x1x32x128xf32>
    tpu.vector_store %arg9[%c0_77, %c2_78, %87, %c0_79], %90 {strides = array<i32>} : memref<1x8x32x128xf32, #tpu.memory_space<vmem>>, vector<1x1x32x128xf32>,
    %c0_80 = arith.constant 0 : index
    %c2_81 = arith.constant 2 : index
    %91 = arith.index_cast %30 : i32 to index
    %c0_82 = arith.constant 0 : index
    %92 = vector.load %arg8[%c0_80, %c2_81, %91, %c0_82] : memref<1x8x32x128xf32, #tpu.memory_space<vmem>>, vector<1x1x32x128xf32>
    %93 = vector.shape_cast %92 : vector<1x1x32x128xf32> to vector<32x128xf32>
    %94 = vector.shape_cast %86 : vector<32x128xf32> to vector<1x1x32x128xf32>
    tpu.vector_store %arg8[%c0_80, %c2_81, %91, %c0_82], %94 {strides = array<i32>} : memref<1x8x32x128xf32, #tpu.memory_space<vmem>>, vector<1x1x32x128xf32>,
    %c0_83 = arith.constant 0 : index
    %c3_84 = arith.constant 3 : index
    %95 = arith.index_cast %30 : i32 to index
    %c0_85 = arith.constant 0 : index
    %96 = vector.load %arg3[%c0_83, %c3_84, %95, %c0_85] : memref<1x8x32x128xf32, #tpu.memory_space<vmem>>, vector<1x1x32x128xf32>
    %97 = vector.shape_cast %96 : vector<1x1x32x128xf32> to vector<32x128xf32>
    %98 = vector.broadcast %8 : f32 to vector<32x128xf32>
    %99 = arith.addf %97, %98 : vector<32x128xf32>
    %100 = vector.broadcast %3 : f32 to vector<32x128xf32>
    %101 = arith.mulf %100, %39 : vector<32x128xf32>
    %102 = arith.addf %99, %101 : vector<32x128xf32>
    %103 = vector.broadcast %4 : f32 to vector<32x128xf32>
    %104 = arith.mulf %103, %61 : vector<32x128xf32>
    %105 = arith.addf %102, %104 : vector<32x128xf32>
    %106 = vector.broadcast %5 : f32 to vector<32x128xf32>
    %107 = arith.mulf %106, %86 : vector<32x128xf32>
    %108 = arith.addf %105, %107 : vector<32x128xf32>
    %c0_86 = arith.constant 0 : index
    %c3_87 = arith.constant 3 : index
    %109 = arith.index_cast %30 : i32 to index
    %c0_88 = arith.constant 0 : index
    %110 = vector.load %arg2[%c0_86, %c3_87, %109, %c0_88] : memref<1x8x32x128xf32, #tpu.memory_space<vmem>>, vector<1x1x32x128xf32>
    %111 = vector.shape_cast %110 : vector<1x1x32x128xf32> to vector<32x128xf32>
    %112 = arith.subf %111, %108 : vector<32x128xf32>
    %113 = math.roundeven %112 : vector<32x128xf32>
    %114 = arith.addf %113, %108 : vector<32x128xf32>
    %c0_89 = arith.constant 0 : index
    %c3_90 = arith.constant 3 : index
    %115 = arith.index_cast %30 : i32 to index
    %c0_91 = arith.constant 0 : index
    %116 = vector.load %arg9[%c0_89, %c3_90, %115, %c0_91] : memref<1x8x32x128xf32, #tpu.memory_space<vmem>>, vector<1x1x32x128xf32>
    %117 = vector.shape_cast %116 : vector<1x1x32x128xf32> to vector<32x128xf32>
    %118 = vector.shape_cast %108 : vector<32x128xf32> to vector<1x1x32x128xf32>
    tpu.vector_store %arg9[%c0_89, %c3_90, %115, %c0_91], %118 {strides = array<i32>} : memref<1x8x32x128xf32, #tpu.memory_space<vmem>>, vector<1x1x32x128xf32>,
    %c0_92 = arith.constant 0 : index
    %c3_93 = arith.constant 3 : index
    %119 = arith.index_cast %30 : i32 to index
    %c0_94 = arith.constant 0 : index
    %120 = vector.load %arg8[%c0_92, %c3_93, %119, %c0_94] : memref<1x8x32x128xf32, #tpu.memory_space<vmem>>, vector<1x1x32x128xf32>
    %121 = vector.shape_cast %120 : vector<1x1x32x128xf32> to vector<32x128xf32>
    %122 = vector.shape_cast %114 : vector<32x128xf32> to vector<1x1x32x128xf32>
    tpu.vector_store %arg8[%c0_92, %c3_93, %119, %c0_94], %122 {strides = array<i32>} : memref<1x8x32x128xf32, #tpu.memory_space<vmem>>, vector<1x1x32x128xf32>,
    %c0_95 = arith.constant 0 : index
    %c4 = arith.constant 4 : index
    %123 = arith.index_cast %30 : i32 to index
    %c0_96 = arith.constant 0 : index
    %124 = vector.load %arg3[%c0_95, %c4, %123, %c0_96] : memref<1x8x32x128xf32, #tpu.memory_space<vmem>>, vector<1x1x32x128xf32>
    %125 = vector.shape_cast %124 : vector<1x1x32x128xf32> to vector<32x128xf32>
    %126 = vector.broadcast %25 : f32 to vector<32x128xf32>
    %127 = arith.addf %125, %126 : vector<32x128xf32>
    %128 = vector.broadcast %9 : f32 to vector<32x128xf32>
    %129 = arith.mulf %128, %39 : vector<32x128xf32>
    %130 = arith.addf %127, %129 : vector<32x128xf32>
    %131 = vector.broadcast %10 : f32 to vector<32x128xf32>
    %132 = arith.mulf %131, %61 : vector<32x128xf32>
    %133 = arith.addf %130, %132 : vector<32x128xf32>
    %134 = vector.broadcast %11 : f32 to vector<32x128xf32>
    %135 = arith.mulf %134, %86 : vector<32x128xf32>
    %136 = arith.addf %133, %135 : vector<32x128xf32>
    %137 = vector.broadcast %12 : f32 to vector<32x128xf32>
    %138 = arith.mulf %137, %114 : vector<32x128xf32>
    %139 = arith.addf %136, %138 : vector<32x128xf32>
    %c0_97 = arith.constant 0 : index
    %c4_98 = arith.constant 4 : index
    %140 = arith.index_cast %30 : i32 to index
    %c0_99 = arith.constant 0 : index
    %141 = vector.load %arg9[%c0_97, %c4_98, %140, %c0_99] : memref<1x8x32x128xf32, #tpu.memory_space<vmem>>, vector<1x1x32x128xf32>
    %142 = vector.shape_cast %141 : vector<1x1x32x128xf32> to vector<32x128xf32>
    %143 = vector.shape_cast %139 : vector<32x128xf32> to vector<1x1x32x128xf32>
    tpu.vector_store %arg9[%c0_97, %c4_98, %140, %c0_99], %143 {strides = array<i32>} : memref<1x8x32x128xf32, #tpu.memory_space<vmem>>, vector<1x1x32x128xf32>,
    %c0_100 = arith.constant 0 : index
    %c4_101 = arith.constant 4 : index
    %144 = arith.index_cast %30 : i32 to index
    %c0_102 = arith.constant 0 : index
    %145 = vector.load %arg2[%c0_100, %c4_101, %144, %c0_102] : memref<1x8x32x128xf32, #tpu.memory_space<vmem>>, vector<1x1x32x128xf32>
    %146 = vector.shape_cast %145 : vector<1x1x32x128xf32> to vector<32x128xf32>
    %147 = arith.subf %146, %139 : vector<32x128xf32>
    %148 = math.roundeven %147 : vector<32x128xf32>
    %149 = arith.addf %148, %139 : vector<32x128xf32>
    %c0_103 = arith.constant 0 : index
    %c4_104 = arith.constant 4 : index
    %150 = arith.index_cast %30 : i32 to index
    %c0_105 = arith.constant 0 : index
    %151 = vector.load %arg8[%c0_103, %c4_104, %150, %c0_105] : memref<1x8x32x128xf32, #tpu.memory_space<vmem>>, vector<1x1x32x128xf32>
    %152 = vector.shape_cast %151 : vector<1x1x32x128xf32> to vector<32x128xf32>
    %153 = vector.shape_cast %149 : vector<32x128xf32> to vector<1x1x32x128xf32>
    tpu.vector_store %arg8[%c0_103, %c4_104, %150, %c0_105], %153 {strides = array<i32>} : memref<1x8x32x128xf32, #tpu.memory_space<vmem>>, vector<1x1x32x128xf32>,
    %c0_106 = arith.constant 0 : index
    %c5 = arith.constant 5 : index
    %154 = arith.index_cast %30 : i32 to index
    %c0_107 = arith.constant 0 : index
    %155 = vector.load %arg3[%c0_106, %c5, %154, %c0_107] : memref<1x8x32x128xf32, #tpu.memory_space<vmem>>, vector<1x1x32x128xf32>
    %156 = vector.shape_cast %155 : vector<1x1x32x128xf32> to vector<32x128xf32>
    %157 = vector.broadcast %26 : f32 to vector<32x128xf32>
    %158 = arith.addf %156, %157 : vector<32x128xf32>
    %159 = vector.broadcast %13 : f32 to vector<32x128xf32>
    %160 = arith.mulf %159, %39 : vector<32x128xf32>
    %161 = arith.addf %158, %160 : vector<32x128xf32>
    %162 = vector.broadcast %14 : f32 to vector<32x128xf32>
    %163 = arith.mulf %162, %61 : vector<32x128xf32>
    %164 = arith.addf %161, %163 : vector<32x128xf32>
    %165 = vector.broadcast %15 : f32 to vector<32x128xf32>
    %166 = arith.mulf %165, %86 : vector<32x128xf32>
    %167 = arith.addf %164, %166 : vector<32x128xf32>
    %168 = vector.broadcast %16 : f32 to vector<32x128xf32>
    %169 = arith.mulf %168, %114 : vector<32x128xf32>
    %170 = arith.addf %167, %169 : vector<32x128xf32>
    %c0_108 = arith.constant 0 : index
    %c5_109 = arith.constant 5 : index
    %171 = arith.index_cast %30 : i32 to index
    %c0_110 = arith.constant 0 : index
    %172 = vector.load %arg9[%c0_108, %c5_109, %171, %c0_110] : memref<1x8x32x128xf32, #tpu.memory_space<vmem>>, vector<1x1x32x128xf32>
    %173 = vector.shape_cast %172 : vector<1x1x32x128xf32> to vector<32x128xf32>
    %174 = vector.shape_cast %170 : vector<32x128xf32> to vector<1x1x32x128xf32>
    tpu.vector_store %arg9[%c0_108, %c5_109, %171, %c0_110], %174 {strides = array<i32>} : memref<1x8x32x128xf32, #tpu.memory_space<vmem>>, vector<1x1x32x128xf32>,
    %c0_111 = arith.constant 0 : index
    %c5_112 = arith.constant 5 : index
    %175 = arith.index_cast %30 : i32 to index
    %c0_113 = arith.constant 0 : index
    %176 = vector.load %arg2[%c0_111, %c5_112, %175, %c0_113] : memref<1x8x32x128xf32, #tpu.memory_space<vmem>>, vector<1x1x32x128xf32>
    %177 = vector.shape_cast %176 : vector<1x1x32x128xf32> to vector<32x128xf32>
    %178 = arith.subf %177, %170 : vector<32x128xf32>
    %179 = math.roundeven %178 : vector<32x128xf32>
    %180 = arith.addf %179, %170 : vector<32x128xf32>
    %c0_114 = arith.constant 0 : index
    %c5_115 = arith.constant 5 : index
    %181 = arith.index_cast %30 : i32 to index
    %c0_116 = arith.constant 0 : index
    %182 = vector.load %arg8[%c0_114, %c5_115, %181, %c0_116] : memref<1x8x32x128xf32, #tpu.memory_space<vmem>>, vector<1x1x32x128xf32>
    %183 = vector.shape_cast %182 : vector<1x1x32x128xf32> to vector<32x128xf32>
    %184 = vector.shape_cast %180 : vector<32x128xf32> to vector<1x1x32x128xf32>
    tpu.vector_store %arg8[%c0_114, %c5_115, %181, %c0_116], %184 {strides = array<i32>} : memref<1x8x32x128xf32, #tpu.memory_space<vmem>>, vector<1x1x32x128xf32>,
    %c0_117 = arith.constant 0 : index
    %c6 = arith.constant 6 : index
    %185 = arith.index_cast %30 : i32 to index
    %c0_118 = arith.constant 0 : index
    %186 = vector.load %arg3[%c0_117, %c6, %185, %c0_118] : memref<1x8x32x128xf32, #tpu.memory_space<vmem>>, vector<1x1x32x128xf32>
    %187 = vector.shape_cast %186 : vector<1x1x32x128xf32> to vector<32x128xf32>
    %188 = vector.broadcast %27 : f32 to vector<32x128xf32>
    %189 = arith.addf %187, %188 : vector<32x128xf32>
    %190 = vector.broadcast %17 : f32 to vector<32x128xf32>
    %191 = arith.mulf %190, %39 : vector<32x128xf32>
    %192 = arith.addf %189, %191 : vector<32x128xf32>
    %193 = vector.broadcast %18 : f32 to vector<32x128xf32>
    %194 = arith.mulf %193, %61 : vector<32x128xf32>
    %195 = arith.addf %192, %194 : vector<32x128xf32>
    %196 = vector.broadcast %19 : f32 to vector<32x128xf32>
    %197 = arith.mulf %196, %86 : vector<32x128xf32>
    %198 = arith.addf %195, %197 : vector<32x128xf32>
    %199 = vector.broadcast %20 : f32 to vector<32x128xf32>
    %200 = arith.mulf %199, %114 : vector<32x128xf32>
    %201 = arith.addf %198, %200 : vector<32x128xf32>
    %c0_119 = arith.constant 0 : index
    %c6_120 = arith.constant 6 : index
    %202 = arith.index_cast %30 : i32 to index
    %c0_121 = arith.constant 0 : index
    %203 = vector.load %arg9[%c0_119, %c6_120, %202, %c0_121] : memref<1x8x32x128xf32, #tpu.memory_space<vmem>>, vector<1x1x32x128xf32>
    %204 = vector.shape_cast %203 : vector<1x1x32x128xf32> to vector<32x128xf32>
    %205 = vector.shape_cast %201 : vector<32x128xf32> to vector<1x1x32x128xf32>
    tpu.vector_store %arg9[%c0_119, %c6_120, %202, %c0_121], %205 {strides = array<i32>} : memref<1x8x32x128xf32, #tpu.memory_space<vmem>>, vector<1x1x32x128xf32>,
    %c0_122 = arith.constant 0 : index
    %c6_123 = arith.constant 6 : index
    %206 = arith.index_cast %30 : i32 to index
    %c0_124 = arith.constant 0 : index
    %207 = vector.load %arg2[%c0_122, %c6_123, %206, %c0_124] : memref<1x8x32x128xf32, #tpu.memory_space<vmem>>, vector<1x1x32x128xf32>
    %208 = vector.shape_cast %207 : vector<1x1x32x128xf32> to vector<32x128xf32>
    %209 = arith.subf %208, %201 : vector<32x128xf32>
    %210 = math.roundeven %209 : vector<32x128xf32>
    %211 = arith.addf %210, %201 : vector<32x128xf32>
    %c0_125 = arith.constant 0 : index
    %c6_126 = arith.constant 6 : index
    %212 = arith.index_cast %30 : i32 to index
    %c0_127 = arith.constant 0 : index
    %213 = vector.load %arg8[%c0_125, %c6_126, %212, %c0_127] : memref<1x8x32x128xf32, #tpu.memory_space<vmem>>, vector<1x1x32x128xf32>
    %214 = vector.shape_cast %213 : vector<1x1x32x128xf32> to vector<32x128xf32>
    %215 = vector.shape_cast %211 : vector<32x128xf32> to vector<1x1x32x128xf32>
    tpu.vector_store %arg8[%c0_125, %c6_126, %212, %c0_127], %215 {strides = array<i32>} : memref<1x8x32x128xf32, #tpu.memory_space<vmem>>, vector<1x1x32x128xf32>,
    %c0_128 = arith.constant 0 : index
    %c7 = arith.constant 7 : index
    %216 = arith.index_cast %30 : i32 to index
    %c0_129 = arith.constant 0 : index
    %217 = vector.load %arg3[%c0_128, %c7, %216, %c0_129] : memref<1x8x32x128xf32, #tpu.memory_space<vmem>>, vector<1x1x32x128xf32>
    %218 = vector.shape_cast %217 : vector<1x1x32x128xf32> to vector<32x128xf32>
    %219 = vector.broadcast %28 : f32 to vector<32x128xf32>
    %220 = arith.addf %218, %219 : vector<32x128xf32>
    %221 = vector.broadcast %21 : f32 to vector<32x128xf32>
    %222 = arith.mulf %221, %39 : vector<32x128xf32>
    %223 = arith.addf %220, %222 : vector<32x128xf32>
    %224 = vector.broadcast %22 : f32 to vector<32x128xf32>
    %225 = arith.mulf %224, %61 : vector<32x128xf32>
    %226 = arith.addf %223, %225 : vector<32x128xf32>
    %227 = vector.broadcast %23 : f32 to vector<32x128xf32>
    %228 = arith.mulf %227, %86 : vector<32x128xf32>
    %229 = arith.addf %226, %228 : vector<32x128xf32>
    %230 = vector.broadcast %24 : f32 to vector<32x128xf32>
    %231 = arith.mulf %230, %114 : vector<32x128xf32>
    %232 = arith.addf %229, %231 : vector<32x128xf32>
    %c0_130 = arith.constant 0 : index
    %c7_131 = arith.constant 7 : index
    %233 = arith.index_cast %30 : i32 to index
    %c0_132 = arith.constant 0 : index
    %234 = vector.load %arg9[%c0_130, %c7_131, %233, %c0_132] : memref<1x8x32x128xf32, #tpu.memory_space<vmem>>, vector<1x1x32x128xf32>
    %235 = vector.shape_cast %234 : vector<1x1x32x128xf32> to vector<32x128xf32>
    %236 = vector.shape_cast %232 : vector<32x128xf32> to vector<1x1x32x128xf32>
    tpu.vector_store %arg9[%c0_130, %c7_131, %233, %c0_132], %236 {strides = array<i32>} : memref<1x8x32x128xf32, #tpu.memory_space<vmem>>, vector<1x1x32x128xf32>,
    %c0_133 = arith.constant 0 : index
    %c7_134 = arith.constant 7 : index
    %237 = arith.index_cast %30 : i32 to index
    %c0_135 = arith.constant 0 : index
    %238 = vector.load %arg2[%c0_133, %c7_134, %237, %c0_135] : memref<1x8x32x128xf32, #tpu.memory_space<vmem>>, vector<1x1x32x128xf32>
    %239 = vector.shape_cast %238 : vector<1x1x32x128xf32> to vector<32x128xf32>
    %240 = arith.subf %239, %232 : vector<32x128xf32>
    %241 = math.roundeven %240 : vector<32x128xf32>
    %242 = arith.addf %241, %232 : vector<32x128xf32>
    %c0_136 = arith.constant 0 : index
    %c7_137 = arith.constant 7 : index
    %243 = arith.index_cast %30 : i32 to index
    %c0_138 = arith.constant 0 : index
    %244 = vector.load %arg8[%c0_136, %c7_137, %243, %c0_138] : memref<1x8x32x128xf32, #tpu.memory_space<vmem>>, vector<1x1x32x128xf32>
    %245 = vector.shape_cast %244 : vector<1x1x32x128xf32> to vector<32x128xf32>
    %246 = vector.shape_cast %242 : vector<32x128xf32> to vector<1x1x32x128xf32>
    tpu.vector_store %arg8[%c0_136, %c7_137, %243, %c0_138], %246 {strides = array<i32>} : memref<1x8x32x128xf32, #tpu.memory_space<vmem>>, vector<1x1x32x128xf32>,
    %c1_i32 = arith.constant 1 : i32
    return
  }
  func.func @transform_0(%arg0: i32, %arg1: i32) -> (i32, i32, i32, i32) {
    %c0_i32 = arith.constant 0 : i32
    %c0_i32_0 = arith.constant 0 : i32
    %c0_i32_1 = arith.constant 0 : i32
    return %arg0, %c0_i32, %arg1, %c0_i32_0 : i32, i32, i32, i32
  }
  func.func @transform_1(%arg0: i32, %arg1: i32) -> (i32, i32, i32, i32) {
    %c0_i32 = arith.constant 0 : i32
    %c0_i32_0 = arith.constant 0 : i32
    %c0_i32_1 = arith.constant 0 : i32
    return %arg0, %c0_i32, %arg1, %c0_i32_0 : i32, i32, i32, i32
  }
  func.func @transform_2(%arg0: i32, %arg1: i32) -> (i32, i32) {
    %c0_i32 = arith.constant 0 : i32
    %c0_i32_0 = arith.constant 0 : i32
    %c0_i32_1 = arith.constant 0 : i32
    return %c0_i32, %c0_i32_0 : i32, i32
  }
  func.func @transform_3(%arg0: i32, %arg1: i32) -> i32 {
    %c0_i32 = arith.constant 0 : i32
    %c0_i32_0 = arith.constant 0 : i32
    return %c0_i32 : i32
  }
  func.func @transform_4(%arg0: i32, %arg1: i32) -> (i32, i32) {
    %c0_i32 = arith.constant 0 : i32
    %c0_i32_0 = arith.constant 0 : i32
    %c0_i32_1 = arith.constant 0 : i32
    return %c0_i32, %c0_i32_0 : i32, i32
  }
  func.func @transform_5(%arg0: i32, %arg1: i32) -> i32 {
    %c0_i32 = arith.constant 0 : i32
    %c0_i32_0 = arith.constant 0 : i32
    return %c0_i32 : i32
  }
  func.func @transform_6(%arg0: i32, %arg1: i32) -> (i32, i32, i32, i32) {
    %c0_i32 = arith.constant 0 : i32
    %c0_i32_0 = arith.constant 0 : i32
    %c0_i32_1 = arith.constant 0 : i32
    return %arg0, %c0_i32, %arg1, %c0_i32_0 : i32, i32, i32, i32
  }
  func.func @transform_7(%arg0: i32, %arg1: i32) -> (i32, i32, i32, i32) {
    %c0_i32 = arith.constant 0 : i32
    %c0_i32_0 = arith.constant 0 : i32
    %c0_i32_1 = arith.constant 0 : i32
    return %arg0, %c0_i32, %arg1, %c0_i32_0 : i32, i32, i32, i32
  }
}

</mosaic_0001>

<bundles_post_ra>
// kernel: tpu_custom_call.1
= control target key start
LH: loop header
LB: loop body
LE: loop exit
PB: predicated region body
PF: predicated region fallthrough
CT: control target
= control target key end

     0   :  { %s2543_s0 = inlined_call_operand.hbm [shape: f32[2,8,32,128], index: 0, kind: input, shape index: {}]   ;;  %s2544_s1 = inlined_call_operand.hbm [shape: f32[2,8,32,128], index: 1, kind: input, shape index: {}]   ;;  %s2545_s2 = inlined_call_operand.vmem [shape: f32[3,3], index: 2, kind: input, shape index: {}]   ;;  %s2546_s3 = inlined_call_operand.vmem [shape: f32[3], index: 3, kind: input, shape index: {}]   ;;  %s2547_s4 = inlined_call_operand.vmem [shape: f32[4,4], index: 4, kind: input, shape index: {}]   ;;  %s2548_s5 = inlined_call_operand.vmem [shape: f32[4], index: 5, kind: input, shape index: {}]   ;;  %s2549_s6 = inlined_call_operand.hbm [shape: f32[2,8,32,128], index: 6, kind: output, shape index: {0}]   ;;  %s2550_s7 = inlined_call_operand.hbm [shape: f32[2,8,32,128], index: 7, kind: output, shape index: {1}]  }
   0x1   :  { %2558 = sst [smem:[#allocation25_spill]] %s2543_s0 }
   0x2   :  { %2559 = sst [smem:[#allocation26_spill]] %s2545_s2 }
   0x3   :  { %2560 = sst [smem:[#allocation27_spill]] %s2546_s3 }
   0x4   :  { %2561 = sst [smem:[#allocation28_spill]] %s2547_s4 }
   0x5   :  { %2562 = sst [smem:[#allocation29_spill]] %s2548_s5 }
   0x6   :  { %13 = vsyncpa [#allocation3], 0 }
   0x7   :  { %15 = vsyncpa [#allocation3 + $0x1], 0 }
   0x8   :  { %16 = vsyncpa [#allocation7], 0 }
   0x9   :  { %18 = vsyncpa [#allocation7 + $0x1], 0 }
   0xa   :  { %19 = vsyncpa [#allocation5], 0 }
   0xb   :  { %20 = vsyncpa [#allocation10], 0 }
   0xc   :  { %21 = vsyncpa [#allocation13], 0 }
   0xd   :  { %22 = vsyncpa [#allocation4], 0 }
   0xe   :  { %24 = vsyncpa [#allocation4 + $0x1], 0 }
   0xf   :  { %25 = vsyncpa [#allocation16], 0 }
  0x10   :  { %27 = vsyncpa [#allocation16 + $0x1], 0  ;;  %s1830_s24 = smov 0   ;;  %s1832_s25 = smov 0  }
  0x11   :  { %s1834_s26 = smov 0   ;;  %s1836_s27 = smov 0  }
  0x12   :  { %s1838_s28 = smov 0   ;;  %s1840_s29 = smov 0  }
  0x13 LB: > { %s1205_s30 = sadd.s32 4294967295, %s1776_s29   ;;  %s1206_s8 = sadd.s32 4294967294, %s1776_s29   ;;  %s1776_s29 = sphi %s1840_s29, %s33_s29   ;;  %s1772_s28 = sphi %s1838_s28, %s2591_s28   ;;  %s1768_s27 = sphi %s1836_s27, %s2590_s27   ;;  %s1764_s26 = sphi %s1834_s26, %s2589_s26   ;;  %s1760_s25 = sphi %s1832_s25, %s2588_s25   ;;  %s1756_s24 = sphi %s1830_s24, %s2587_s24  }
  0x14   : > { %p67_p0 = scmp.ne.s32.totalorder %s1760_s25, %s1756_s24  ;;  %p1864_p1 = scmp.eq.s32.totalorder %s1205_s30, 0 }
  0x15   : > { %p1868_p2 = scmp.eq.s32.totalorder %s1205_s30, 1  ;;  %p211_p3 = scmp.eq.s32.totalorder %s1206_s8, 1 }
  0x16   : > { %s2563_s9 = scalar_select %p1864_p1, 1, 0 }
  0x17   : > { %s2564_s10 = scalar_select %p1868_p2, 1, 0 }
  0x18   : > { %p1874_p4 = por %p1864_p1, %p67_p0  ;;  %p1207_p5 = scmp.ge.s32.totalorder %s1776_s29, 1 }
  0x19   : > { %p1879_p6 = por %p211_p3, %p67_p0  ;;  %p246_p7 = scmp.lt.s32.totalorder %s1776_s29, 3 }
  0x1a   : > { %s2565_s11 = scalar_select %p1874_p4, 1, 0 }
  0x1b   : > { %s2566_s12 = scalar_select %p1879_p6, 1, 0 }
  0x1c   : > { %s2567_s3 = sld [smem:[#allocation27_spill]]  ;;  %p1887_p8 = pnand %p1207_p5, %p246_p7 }
  0x1d   : > { %s2569_s2 = sld [smem:[#allocation26_spill]]  ;;  %s2571_s4 = sld [smem:[#allocation28_spill]] }
  0x1e   : > { %s2568_s16 = scalar_select %p1887_p8, 1, 0 }
  0x1f   : > { %p1433_p10 = pneg %p1887_p8 }
  0x21   : > { %p1899_p11 = pnand %p1433_p10, %p1864_p1 }
  0x22   : > { %s270_s15 = sshll.u32 %s2567_s3, 4  ;;  %s271_s15 = int_to_ptr.vmem [resolvable:$true] %s270_s15 }
  0x23   : > { %s259_s19 = sshll.u32 %s2569_s2, 4  ;;  %s281_s23 = sshll.u32 %s2571_s4, 4  ;;  %s260_s19 = int_to_ptr.vmem [resolvable:$true] %s259_s19  ;;  %s1906_s23 = int_to_ptr.vmem [resolvable:$true] %s281_s23 }
  0x24   : > { %s1526_s30 = scalar_lea.vmem %s271_s15, 16  ;;  %p1528_p13 = pneg %p1899_p11 }
  0x25   : > { %p1527_p12 = scmp.ne.s32.totalorder %s271_s15, %s1526_s30  ;;  %p1534_p5 = scmp.lt.s32.totalorder %s271_s15, %s271_s15 }
  0x26   : > { %p1535_p7 = scmp.lt.s32.totalorder %s1526_s30, %s1526_s30 }
  0x27   : > { %p1529_p0 = pnand %p1528_p13, %p1527_p12 }
  0x28   : > { %p1536_p10 = por %p1535_p7, %p1534_p5 }
  0x29   : > { %p1530_p3 = pneg %p1529_p0 }
  0x2b   : > { %p1537_p9 = pnand %p1536_p10, %p1530_p3 }
  0x2d   : > { %1540 = shalt.err (!%p1537_p9)
}
  0x2e   : > { %s1778_s8 = smov [#allocation9]   ;;  %s1541_s13 = scalar_lea.vmem %s260_s19, 64 }
  0x2f   : > { %1439 = dma.vmem_to_smem (!%p1899_p11), %s271_s15, 16, %s1778_s8, [#allocation10]  }
  0x30   : > { %p1542_p6 = scmp.ne.s32.totalorder %s260_s19, %s1541_s13  ;;  %p1549_p8 = scmp.lt.s32.totalorder %s260_s19, %s260_s19 }
  0x31   : > { %p1550_p2 = scmp.lt.s32.totalorder %s1541_s13, %s1541_s13 }
  0x32   : > { %p1544_p1 = pnand %p1542_p6, %p1528_p13 }
  0x33   : > { %p1551_p12 = por %p1550_p2, %p1549_p8 }
  0x34   : > { %p1545_p4 = pneg %p1544_p1 }
  0x36   : > { %p1552_p0 = pnand %p1551_p12, %p1545_p4 }
  0x38   : > { %1555 = shalt.err (!%p1552_p0)
}
  0x39   : > { %s1779_s14 = smov [#allocation8]   ;;  %s2572_s5 = sld [smem:[#allocation29_spill]] }
  0x3a   : > { %1436 = dma.vmem_to_smem (!%p1899_p11), %s260_s19, 64, %s1779_s14, [#allocation5]  }
  0x3b   : > { %s1556_s21 = scalar_lea.vmem %s1906_s23, 64  ;;  %p1564_p4 = scmp.lt.s32.totalorder %s1906_s23, %s1906_s23 }
  0x3c   : > { %p1557_p6 = scmp.ne.s32.totalorder %s1906_s23, %s1556_s21  ;;  %p1565_p8 = scmp.lt.s32.totalorder %s1556_s21, %s1556_s21 }
  0x3e   : > { %p1559_p1 = pnand %p1557_p6, %p1528_p13  ;;  %p1566_p9 = por %p1565_p8, %p1564_p4 }
  0x3f   : > { %s292_s18 = sshll.u32 %s2572_s5, 4  ;;  %s293_s18 = int_to_ptr.vmem [resolvable:$true] %s292_s18 }
  0x40   : > { %p1560_p2 = pneg %p1559_p1 }
  0x42   : > { %p1567_p3 = pnand %p1566_p9, %p1560_p2 }
  0x44   : > { %1570 = shalt.err (!%p1567_p3)
}
  0x45   : > { %s1780_s22 = smov [#allocation11]   ;;  %s1571_s19 = scalar_lea.vmem %s293_s18, 16 }
  0x46   : > { %1442 = dma.vmem_to_smem (!%p1899_p11), %s1906_s23, 64, %s1780_s22, [#allocation10]  }
  0x47   : > { %p1572_p5 = scmp.ne.s32.totalorder %s293_s18, %s1571_s19  ;;  %p1579_p12 = scmp.lt.s32.totalorder %s293_s18, %s293_s18 }
  0x48   : > { %p1580_p0 = scmp.lt.s32.totalorder %s1571_s19, %s1571_s19 }
  0x49   : > { %p1574_p7 = pnand %p1572_p5, %p1528_p13 }
  0x4a   : > { %p1581_p6 = por %p1580_p0, %p1579_p12 }
  0x4b   : > { %p1575_p10 = pneg %p1574_p7 }
  0x4d   : > { %p1582_p1 = pnand %p1581_p6, %p1575_p10 }
  0x4f   : > { %1585 = shalt.err (!%p1582_p1)
}
  0x50   : > { %s1781_s30 = smov [#allocation12]   ;;  %s45_s23 = sadd.s32 1, %s1772_s28 }
  0x51   : > { %1445 = dma.vmem_to_smem (!%p1899_p11), %s293_s18, 16, %s1781_s30, [#allocation13]  }
  0x52   : > { %s54_s8 = sadd.s32 1, %s1764_s26  ;;  %p47_p13 = scmp.ge.s32.totalorder %s45_s23, 2 }
  0x53   : > { %p61_p2 = scmp.ne.s32.totalorder %s1764_s26, %s1760_s25  ;;  %p62_p4 = scmp.eq.s32.totalorder %s1776_s29, 0 }
  0x54   : > { %p1464_p8 = scmp.lt.s32.totalorder %s1776_s29, 2  ;;  %s2593_s23 = smov (%p47_p13, %s45_s23), 0 }
  0x55   : > { %2573 = sst [smem:[#allocation24_spill]] %s2593_s23  ;;  %p63_p9 = por %p62_p4, %p61_p2 }
  0x56   : > { %p2574_p3 = scmp.ne.s32.totalorder %s2564_s10, 0  ;;  %s49_s13 = ssub.s32 %s1772_s28, %s2593_s23 }
  0x57   : > { %s1955_s14 = sand.u32 1, %s1764_s26   ;;  %p52_p11 = scmp.eq.s32.totalorder %s49_s13, 0 }
  0x58   : > { %p1948_p5 = por %p2574_p3, %p61_p2  ;;  %s2555_s15 = sshll.u32 %s1955_s14, 8 }
  0x59   : > { %s2556_s17 = sshll.u32 %s1772_s28, 12  ;;  %s2576_s0 = sld [smem:[#allocation25_spill]] }
  0x5a   : > { %s1960_s18 = scalar_select %p52_p11, %s1764_s26, %s54_s8  }
  0x5b   : > { %s307_s19 = scalar_lea.vmem [#allocation2], %s2555_s15  ;;  %p1973_p7 = pnand %p1464_p8, %p63_p9 }
  0x5c   : > { %s316_s30 = sshll.u32 %s307_s19, 4  ;;  %s1977_s30 = int_to_ptr.vmem [resolvable:$true] %s316_s30 }
  0x5d   : > { %p1588_p12 = pneg %p1973_p7 }
  0x5f   : > { %s1967_s10 = scalar_lea.hbm %s2576_s0, %s2556_s17  ;;  %s1591_s15 = scalar_lea.hbm %s2576_s0, 8192 }
  0x60   : > { %s1586_s21 = scalar_lea.hbm %s1967_s10, 4096  ;;  %p1592_p1 = scmp.lt.u32.totalorder %s1967_s10, %s2576_s0 }
  0x61   : > { %p1587_p10 = scmp.ne.s32.totalorder %s1967_s10, %s1586_s21  ;;  %p1593_p13 = scmp.lt.u32.totalorder %s1591_s15, %s1586_s21 }
  0x62   : > { %p1595_p4 = scmp.lt.u32.totalorder %s1586_s21, %s1967_s10 }
  0x63   : > { %p1589_p0 = pnand %p1588_p12, %p1587_p10  ;;  %p1594_p2 = por %p1593_p13, %p1592_p1 }
  0x65   : > { %p1590_p6 = pneg %p1589_p0  ;;  %p1596_p8 = por %p1595_p4, %p1594_p2 }
  0x67   : > { %p1597_p9 = pnand %p1596_p8, %p1590_p6 }
  0x69   : > { %1600 = shalt.err (!%p1597_p9)
}
  0x6a   : > { %s1601_s8 = scalar_lea.vmem %s1977_s30, 4096  ;;  %s1782_s22 = smov [#allocation2]  }
  0x6b   : > { %p1602_p3 = scmp.ne.s32.totalorder %s1977_s30, %s1601_s8  ;;  %s1606_s19 = sshll.u32 %s1782_s22, 4  ;;  %s1607_s19 = int_to_ptr.vmem [resolvable:$false] %s1606_s19 }
  0x6c   : > { %s1608_s2 = scalar_lea.vmem %s1607_s19, 8192  ;;  %p1609_p0 = scmp.lt.s32.totalorder %s1977_s30, %s1607_s19 }
  0x6d   : > { %p1604_p11 = pnand %p1602_p3, %p1588_p12  ;;  %p1610_p1 = scmp.lt.s32.totalorder %s1608_s2, %s1601_s8 }
  0x6f   : > { %p1605_p10 = pneg %p1604_p11  ;;  %p1611_p13 = por %p1610_p1, %p1609_p0 }
  0x71   : > { %p1612_p2 = pnand %p1611_p13, %p1605_p10 }
  0x73   : > { %1615 = shalt.err (!%p1612_p2)
}
  0x74   : > { %s1783_s15 = smov 128   ;;  %s1784_s17 = smov 8  }
  0x75   : > { %s2578_s21 = scalar_lea.sflag [#allocation3], %s1955_s14  ;;  %s2579_s8 = sshll.u32 %s1772_s28, 12 }
  0x76   : > { %1449 = dma.hbm_to_vmem [thread:$0]  (!%p1973_p7), %s1967_s10, 4096, %s1977_s30, %s2578_s21, %s1783_s15, %s1783_s15, %s1784_s17  }
  0x77   : > { %s2015_s2 = scalar_lea.hbm %s2544_s1, %s2579_s8  ;;  %s2580_s0 = sshll.u32 %s1955_s14, 8 }
  0x78   : > { %s330_s3 = scalar_lea.vmem [#allocation6], %s2580_s0  ;;  %s327_s5 = scalar_lea.sflag [#allocation7], %s1955_s14 }
  0x79   : > { %s339_s4 = sshll.u32 %s330_s3, 4  ;;  %s1616_s23 = scalar_lea.hbm %s2015_s2, 4096  ;;  %s2019_s4 = int_to_ptr.vmem [resolvable:$true] %s339_s4 }
  0x7a   : > { %p1617_p6 = scmp.ne.s32.totalorder %s2015_s2, %s1616_s23  ;;  %s1621_s21 = scalar_lea.hbm %s2544_s1, 8192 }
  0x7b   : > { %p1622_p9 = scmp.lt.u32.totalorder %s2015_s2, %s2544_s1  ;;  %p1623_p3 = scmp.lt.u32.totalorder %s1621_s21, %s1616_s23 }
  0x7c   : > { %p1619_p4 = pnand %p1617_p6, %p1588_p12  ;;  %p1625_p10 = scmp.lt.u32.totalorder %s1616_s23, %s2015_s2 }
  0x7d   : > { %p1624_p11 = por %p1623_p3, %p1622_p9 }
  0x7e   : > { %p1620_p8 = pneg %p1619_p4 }
  0x7f   : > { %p1626_p0 = por %p1625_p10, %p1624_p11 }
  0x81   : > { %p1627_p1 = pnand %p1626_p0, %p1620_p8 }
  0x83   : > { %1630 = shalt.err (!%p1627_p1)
}
  0x84   : > { %s1631_s0 = scalar_lea.vmem %s2019_s4, 4096  ;;  %s1785_s3 = smov [#allocation6]  }
  0x85   : > { %p1632_p13 = scmp.ne.s32.totalorder %s2019_s4, %s1631_s0  ;;  %s1636_s19 = sshll.u32 %s1785_s3, 4  ;;  %s1637_s19 = int_to_ptr.vmem [resolvable:$false] %s1636_s19 }
  0x86   : > { %s1638_s10 = scalar_lea.vmem %s1637_s19, 8192  ;;  %p1639_p4 = scmp.lt.s32.totalorder %s2019_s4, %s1637_s19 }
  0x87   : > { %p1634_p2 = pnand %p1632_p13, %p1588_p12  ;;  %p1640_p9 = scmp.lt.s32.totalorder %s1638_s10, %s1631_s0 }
  0x89   : > { %p1635_p6 = pneg %p1634_p2  ;;  %p1641_p3 = por %p1640_p9, %p1639_p4 }
  0x8b   : > { %p1642_p11 = pnand %p1641_p3, %p1635_p6 }
  0x8d   : > { %1645 = shalt.err (!%p1642_p11)
}
  0x8e   : > { %1452 = dma.hbm_to_vmem [thread:$0]  (!%p1973_p7), %s2015_s2, 4096, %s2019_s4, %s327_s5, %s1783_s15, %s1783_s15, %s1784_s17  }
  0x8f   : > { %p2581_p12 = scmp.ne.s32.totalorder %s2568_s16, 0 }
  0x90   : > { %s2053_s23 = sand.u32 (!%p2581_p12), 1, %s1760_s25   ;;  %p2582_p8 = scmp.ne.s32.totalorder (!%p2581_p12), %s2565_s11, 0 }
  0x91   : > { %351 = sbr.rel (%p2581_p12) target bundleno = 293 (0x125), region = 44  ;;  %s2056_s30 = sshll.u32 (!%p2581_p12), %s2053_s23, 8 }
  0x92   : > { %s354_s13 = scalar_lea.sflag (!%p2581_p12), [#allocation3], %s2053_s23  ;;  %s2060_s21 = scalar_lea.vmem (!%p2581_p12), [#allocation2], %s2056_s30 }
  0x98   : > { %1727 = dma.done.wait (%p2582_p8), %s354_s13, 4096  }
  0x99   : > { %1729 = vsyncadd (%p2582_p8), %s354_s13, 4294963200  ;;  %s363_s4 = scalar_lea.sflag [#allocation7], %s2053_s23  ;;  %s2068_s5 = scalar_lea.vmem [#allocation6], %s2056_s30 }
  0x9a   : > { %1731 = dma.done.wait (%p2582_p8), %s363_s4, 4096  }
  0x9b   : > { %1733 = vsyncadd (%p2582_p8), %s363_s4, 4294963200  ;;  %p2583_p7 = scmp.ne.s32.totalorder %s2563_s9, 0 }
  0x9d   : > { %1735 = dma.done.wait (%p2583_p7), [#allocation5], 64  }
  0x9e   : > { %1737 = vsyncadd (%p2583_p7), [#allocation5], 4294967232 }
  0x9f   : > { %1739 = dma.done.wait (%p2583_p7), [#allocation10], 80  }
  0xa0   : > { %1741 = vsyncadd (%p2583_p7), [#allocation10], 4294967216 }
  0xa1   : > { %1743 = dma.done.wait (%p2583_p7), [#allocation13], 16  }
  0xa2   : > { %1745 = vsyncadd (%p2583_p7), [#allocation13], 4294967280 }
  0xa3   : > { %387 = sfence }
  0xa4   : > { %v457_v0 = vld [vmem:[%s2068_s5] sm:$0xff]  ;;  %v458_v2 = vld [vmem:[%s2068_s5 + $0x8] sm:$0xff]  ;;  %s2090_s11 = scalar_lea.vmem [#allocation15], %s2056_s30  ;;  %v459_v5 = vld [vmem:[%s2068_s5 + $0x10] sm:$0xff]  ;;  %s428_s9 = sld [smem:[#allocation8]] }
  0xa5   : > { %v461_v1 = vld [vmem:[%s2060_s21] sm:$0xff]  ;;  %477 = vst [vmem:[%s2090_s11] sm:$0xff] %v457_v0  ;;  %v462_v4 = vld [vmem:[%s2060_s21 + $0x8] sm:$0xff]  ;;  %478 = vst [vmem:[%s2090_s11 + $0x8] sm:$0xff] %v458_v2  ;;  %s434_s16 = sld [smem:[#allocation9]]  ;;  %s2103_s15 = sld [smem:[#allocation8 + $0x81]] }
  0xa6   : > { %v465_v3 = vsub.f32 %v461_v1, %v457_v0  ;;  %v463_v6 = vld [vmem:[%s2060_s21 + $0x10] sm:$0xff]  ;;  %v466_v7 = vsub.f32 %v462_v4, %v458_v2  ;;  %479 = vst [vmem:[%s2090_s11 + $0x10] sm:$0xff] %v459_v5  ;;  %v460_v9 = vld [vmem:[%s2068_s5 + $0x18] sm:$0xff]  ;;  %s2101_s14 = sld [smem:[#allocation8 + $0x80]]  ;;  %v1253_v17 = vld [vmem:[%s2068_s5 + $0x20] sm:$0xff]  ;;  %s2108_s17 = sld [smem:[#allocation9 + $0x1]] }
  0xa7   : > { %v467_v8 = vsub.f32 %v463_v6, %v459_v5  ;;  %v464_v10 = vld [vmem:[%s2060_s21 + $0x18] sm:$0xff]  ;;  %480 = vst [vmem:[%s2090_s11 + $0x18] sm:$0xff] %v460_v9  ;;  %v1254_v20 = vld [vmem:[%s2068_s5 + $0x28] sm:$0xff]  ;;  %v1255_v21 = vld [vmem:[%s2068_s5 + $0x30] sm:$0xff]  ;;  %s2120_s2 = scalar_lea.vmem [#allocation14], %s2056_s30  ;;  %s2136_s8 = sld [smem:[#allocation9 + $0x2]] }
  0xa8   : > { %v1377_v11 = vround.rtne.f32 %v465_v3  ;;  %v468_v12 = vsub.f32 %v464_v10, %v460_v9  ;;  %v1378_v13 = vround.rtne.f32 %v466_v7  ;;  %v1256_v22 = vld [vmem:[%s2068_s5 + $0x38] sm:$0xff]  ;;  %v1257_v30 = vld [vmem:[%s2060_s21 + $0x20] sm:$0xff]  ;;  %v1270_v35 = vld [vmem:[%s2068_s5 + $0x48] sm:$0xff]  ;;  %s2143_s22 = sld [smem:[#allocation8 + $0x100]]  ;;  %s2149_s0 = sld [smem:[#allocation8 + $0x101]] }
  0xa9   : > { %v1379_v14 = vround.rtne.f32 %v467_v8  ;;  %v1269_v34 = vld [vmem:[%s2068_s5 + $0x40] sm:$0xff]  ;;  %v1258_v36 = vld [vmem:[%s2060_s21 + $0x28] sm:$0xff]  ;;  %v1259_v37 = vld [vmem:[%s2060_s21 + $0x30] sm:$0xff]  ;;  %s2151_s3 = sld [smem:[#allocation8 + $0x102]]  ;;  %s2192_s19 = sld [smem:[#allocation12]] }
  0xaa   : > { %v2105_v15 = vadd.f32 %v1377_v11, %v457_v0  ;;  %v1380_v16 = vround.rtne.f32 %v468_v12  ;;  %v2110_v18 = vadd.f32 %v1378_v13, %v458_v2  ;;  %v496_v24 = vstv %s428_s9  ;;  %v1260_v44 = vld [vmem:[%s2060_s21 + $0x38] sm:$0xff]  ;;  %v1271_v46 = vld [vmem:[%s2068_s5 + $0x50] sm:$0xff]  ;;  %v1285_v0 = vld [vmem:[%s2068_s5 + $0x60] sm:$0xff]  ;;  %s2198_s10 = sld [smem:[#allocation11]]  ;;  %s2200_s30 = sld [smem:[#allocation11 + $0x1]] }
  0xab   : > { %v2112_v19 = vadd.f32 %v1379_v14, %v459_v5  ;;  %v491_v25 = vstv %s434_s16  ;;  %v552_v40 = vstv %s2103_s15  ;;  %v1272_v55 = vld [vmem:[%s2068_s5 + $0x58] sm:$0xff]  ;;  %s2208_s13 = sld [smem:[#allocation11 + $0x2]]  ;;  %s2210_s4 = sld [smem:[#allocation11 + $0x3]] }
  0xac   : > { %v2117_v23 = vadd.f32 %v1380_v16, %v460_v9  ;;  %481 = vst [vmem:[%s2120_s2] sm:$0xff] %v2105_v15  ;;  %482 = vst [vmem:[%s2120_s2 + $0x8] sm:$0xff] %v2110_v18  ;;  %v497_v26 = vmul.f32 %v496_v24, %v2105_v15  ;;  %v498_v27 = vmul.f32 %v496_v24, %v2110_v18  ;;  %v543_v39 = vstv %s2101_s14  ;;  %v1286_v9 = vld [vmem:[%s2068_s5 + $0x68] sm:$0xff]  ;;  %s2259_s9 = sld [smem:[#allocation11 + $0x80]]  ;;  %s2261_s16 = sld [smem:[#allocation12 + $0x1]] }
  0xad   : > { %483 = vst [vmem:[%s2120_s2 + $0x10] sm:$0xff] %v2112_v19  ;;  %v499_v28 = vmul.f32 %v496_v24, %v2112_v19  ;;  %v492_v29 = vadd.f32 %v1253_v17, %v491_v25  ;;  %v493_v31 = vadd.f32 %v1254_v20, %v491_v25  ;;  %v494_v32 = vadd.f32 %v1255_v21, %v491_v25  ;;  %v1273_v16 = vld [vmem:[%s2060_s21 + $0x40] sm:$0xff]  ;;  %v1274_v20 = vld [vmem:[%s2060_s21 + $0x48] sm:$0xff]  ;;  %s2271_s14 = sld [smem:[#allocation11 + $0x81]]  ;;  %s2273_s15 = sld [smem:[#allocation11 + $0x82]] }
  0xae   : > { %484 = vst [vmem:[%s2120_s2 + $0x18] sm:$0xff] %v2117_v23  ;;  %v495_v33 = vadd.f32 %v1256_v22, %v491_v25  ;;  %v500_v38 = vmul.f32 %v496_v24, %v2117_v23  ;;  %v538_v45 = vstv %s2108_s17  ;;  %v544_v49 = vmul.f32 %v543_v39, %v2105_v15  ;;  %v1275_v24 = vld [vmem:[%s2060_s21 + $0x50] sm:$0xff]  ;;  %s2289_s17 = sld [smem:[#allocation11 + $0x83]] }
  0xaf   : > { %v501_v41 = vadd.f32 %v497_v26, %v492_v29  ;;  %v502_v42 = vadd.f32 %v498_v27, %v493_v31  ;;  %v503_v43 = vadd.f32 %v499_v28, %v494_v32  ;;  %v539_v48 = vadd.f32 %v1269_v34, %v538_v45  ;;  %v1287_v29 = vld [vmem:[%s2068_s5 + $0x70] sm:$0xff] }
  0xb0   : > { %v504_v47 = vadd.f32 %v500_v38, %v495_v33  ;;  %v540_v50 = vadd.f32 %v1270_v35, %v538_v45  ;;  %v545_v54 = vmul.f32 %v543_v39, %v2110_v18  ;;  %v541_v58 = vadd.f32 %v1271_v46, %v538_v45  ;;  %v1276_v33 = vld [vmem:[%s2060_s21 + $0x58] sm:$0xff] }
  0xb1   : > { %v510_v51 = vsub.f32 %v1257_v30, %v501_v41  ;;  %1261 = vst [vmem:[%s2090_s11 + $0x20] sm:$0xff] %v501_v41  ;;  %v511_v52 = vsub.f32 %v1258_v36, %v502_v42  ;;  %1262 = vst [vmem:[%s2090_s11 + $0x28] sm:$0xff] %v502_v42  ;;  %v512_v53 = vsub.f32 %v1259_v37, %v503_v43  ;;  %v594_v8 = vstv %s2136_s8  ;;  %s2319_s8 = sld [smem:[#allocation11 + $0x100]] }
  0xb2   : > { %1263 = vst [vmem:[%s2090_s11 + $0x30] sm:$0xff] %v503_v43  ;;  %v513_v56 = vsub.f32 %v1260_v44, %v504_v47  ;;  %1264 = vst [vmem:[%s2090_s11 + $0x38] sm:$0xff] %v504_v47  ;;  %v548_v57 = vadd.f32 %v544_v49, %v539_v48  ;;  %v546_v59 = vmul.f32 %v543_v39, %v2112_v19  ;;  %v599_v13 = vstv %s2143_s22  ;;  %s2321_s22 = sld [smem:[#allocation12 + $0x2]] }
  0xb3   : > { %v1381_v60 = vround.rtne.f32 %v510_v51  ;;  %v1382_v61 = vround.rtne.f32 %v511_v52  ;;  %v1383_v62 = vround.rtne.f32 %v512_v53  ;;  %v549_v63 = vadd.f32 %v545_v54, %v540_v50 }
  0xb4   : > { %v1384_v1 = vround.rtne.f32 %v513_v56  ;;  %v550_v2 = vadd.f32 %v546_v59, %v541_v58  ;;  %v542_v3 = vadd.f32 %v1272_v55, %v538_v45  ;;  %v547_v4 = vmul.f32 %v543_v39, %v2117_v23 }
  0xb5   : > { %v2162_v5 = vadd.f32 %v1381_v60, %v501_v41  ;;  %v2164_v6 = vadd.f32 %v1382_v61, %v502_v42  ;;  %v2166_v7 = vadd.f32 %v1383_v62, %v503_v43  ;;  %v595_v12 = vadd.f32 %v1285_v0, %v594_v8  ;;  %v1288_v43 = vld [vmem:[%s2068_s5 + $0x78] sm:$0xff]  ;;  %v1301_v60 = vld [vmem:[%s2068_s5 + $0x80] sm:$0xff] }
  0xb6   : > { %v2170_v10 = vadd.f32 %v1384_v1, %v504_v47  ;;  %v551_v11 = vadd.f32 %v547_v4, %v542_v3  ;;  %v600_v22 = vmul.f32 %v599_v13, %v2105_v15  ;;  %v608_v26 = vstv %s2149_s0  ;;  %s2329_s0 = sld [smem:[#allocation11 + $0x101]] }
  0xb7   : > { %1265 = vst [vmem:[%s2120_s2 + $0x20] sm:$0xff] %v2162_v5  ;;  %1266 = vst [vmem:[%s2120_s2 + $0x28] sm:$0xff] %v2164_v6  ;;  %v553_v14 = vmul.f32 %v552_v40, %v2162_v5  ;;  %v554_v17 = vmul.f32 %v552_v40, %v2164_v6  ;;  %v555_v21 = vmul.f32 %v552_v40, %v2166_v7  ;;  %v617_v27 = vstv %s2151_s3  ;;  %s2331_s3 = sld [smem:[#allocation11 + $0x102]] }
  0xb8   : > { %1267 = vst [vmem:[%s2120_s2 + $0x30] sm:$0xff] %v2166_v7  ;;  %1268 = vst [vmem:[%s2120_s2 + $0x38] sm:$0xff] %v2170_v10  ;;  %v556_v25 = vmul.f32 %v552_v40, %v2170_v10  ;;  %v596_v28 = vadd.f32 %v1286_v9, %v594_v8  ;;  %v604_v34 = vadd.f32 %v600_v22, %v595_v12  ;;  %v2225_v0 = vstv %s2192_s19  ;;  %v1290_v9 = vld [vmem:[%s2060_s21 + $0x68] sm:$0xff]  ;;  %s2338_s19 = sld [smem:[#allocation11 + $0x103]] }
  0xb9   : > { %v557_v30 = vadd.f32 %v553_v14, %v548_v57  ;;  %v558_v31 = vadd.f32 %v554_v17, %v549_v63  ;;  %v559_v32 = vadd.f32 %v555_v21, %v550_v2  ;;  %v609_v36 = vmul.f32 %v608_v26, %v2162_v5  ;;  %v1289_v2 = vld [vmem:[%s2060_s21 + $0x60] sm:$0xff] }
  0xba   : > { %v560_v35 = vadd.f32 %v556_v25, %v551_v11  ;;  %v601_v37 = vmul.f32 %v599_v13, %v2110_v18  ;;  %v610_v38 = vmul.f32 %v608_v26, %v2164_v6  ;;  %v597_v42 = vadd.f32 %v1287_v29, %v594_v8  ;;  %v1291_v11 = vld [vmem:[%s2060_s21 + $0x70] sm:$0xff]  ;;  %v1292_v25 = vld [vmem:[%s2060_s21 + $0x78] sm:$0xff] }
  0xbb   : > { %v566_v39 = vsub.f32 %v1273_v16, %v557_v30  ;;  %1277 = vst [vmem:[%s2090_s11 + $0x40] sm:$0xff] %v557_v30  ;;  %v567_v40 = vsub.f32 %v1274_v20, %v558_v31  ;;  %1278 = vst [vmem:[%s2090_s11 + $0x48] sm:$0xff] %v558_v31  ;;  %v568_v41 = vsub.f32 %v1275_v24, %v559_v32  ;;  %v664_v14 = vstv %s2198_s10  ;;  %v1302_v24 = vld [vmem:[%s2068_s5 + $0x88] sm:$0xff]  ;;  %s2366_s10 = sld [smem:[#allocation12 + $0x3]] }
  0xbc   : > { %1279 = vst [vmem:[%s2090_s11 + $0x50] sm:$0xff] %v559_v32  ;;  %v569_v44 = vsub.f32 %v1276_v33, %v560_v35  ;;  %1280 = vst [vmem:[%s2090_s11 + $0x58] sm:$0xff] %v560_v35  ;;  %v613_v45 = vadd.f32 %v609_v36, %v604_v34  ;;  %v605_v46 = vadd.f32 %v601_v37, %v596_v28  ;;  %v673_v16 = vstv %s2200_s30  ;;  %s2371_s30 = sld [smem:[#allocation11 + $0x180]] }
  0xbd   : > { %v602_v47 = vmul.f32 %v599_v13, %v2112_v19  ;;  %v1385_v48 = vround.rtne.f32 %v566_v39  ;;  %v1386_v49 = vround.rtne.f32 %v567_v40  ;;  %v1387_v50 = vround.rtne.f32 %v568_v41 }
  0xbe   : > { %v611_v51 = vmul.f32 %v608_v26, %v2166_v7  ;;  %v1388_v52 = vround.rtne.f32 %v569_v44  ;;  %v614_v53 = vadd.f32 %v610_v38, %v605_v46  ;;  %v598_v55 = vadd.f32 %v1288_v43, %v594_v8 }
  0xbf   : > { %v606_v54 = vadd.f32 %v602_v47, %v597_v42  ;;  %v2213_v56 = vadd.f32 %v1385_v48, %v557_v30  ;;  %v2215_v57 = vadd.f32 %v1386_v49, %v558_v31  ;;  %v2217_v58 = vadd.f32 %v1387_v50, %v559_v32  ;;  %v1303_v42 = vld [vmem:[%s2068_s5 + $0x90] sm:$0xff] }
  0xc0   : > { %v603_v59 = vmul.f32 %v599_v13, %v2117_v23  ;;  %v2221_v61 = vadd.f32 %v1388_v52, %v560_v35  ;;  %v612_v63 = vmul.f32 %v608_v26, %v2170_v10  ;;  %v660_v13 = vadd.f32 %v1301_v60, %v2225_v0 }
  0xc1   : > { %v615_v62 = vadd.f32 %v611_v51, %v606_v54  ;;  %1281 = vst [vmem:[%s2120_s2 + $0x40] sm:$0xff] %v2213_v56  ;;  %1282 = vst [vmem:[%s2120_s2 + $0x48] sm:$0xff] %v2215_v57  ;;  %v618_v1 = vmul.f32 %v617_v27, %v2213_v56  ;;  %v619_v3 = vmul.f32 %v617_v27, %v2215_v57  ;;  %v682_v29 = vstv %s2208_s13  ;;  %s2373_s13 = sld [smem:[#allocation11 + $0x181]] }
  0xc2   : > { %1283 = vst [vmem:[%s2120_s2 + $0x50] sm:$0xff] %v2217_v58  ;;  %v620_v4 = vmul.f32 %v617_v27, %v2217_v58  ;;  %v607_v8 = vadd.f32 %v603_v59, %v598_v55  ;;  %1284 = vst [vmem:[%s2120_s2 + $0x58] sm:$0xff] %v2221_v61  ;;  %v621_v12 = vmul.f32 %v617_v27, %v2221_v61  ;;  %v691_v30 = vstv %s2210_s4  ;;  %v1304_v55 = vld [vmem:[%s2068_s5 + $0x98] sm:$0xff]  ;;  %s2379_s4 = sld [smem:[#allocation11 + $0x182]] }
  0xc3   : > { %v622_v17 = vadd.f32 %v618_v1, %v613_v45  ;;  %v623_v20 = vadd.f32 %v619_v3, %v614_v53  ;;  %v665_v26 = vmul.f32 %v664_v14, %v2105_v15  ;;  %v674_v28 = vmul.f32 %v673_v16, %v2162_v5 }
  0xc4   : > { %v624_v21 = vadd.f32 %v620_v4, %v615_v62  ;;  %v616_v22 = vadd.f32 %v612_v63, %v607_v8  ;;  %v683_v35 = vmul.f32 %v682_v29, %v2213_v56  ;;  %v661_v36 = vadd.f32 %v1302_v24, %v2225_v0  ;;  %v1309_v8 = vld [vmem:[%s2060_s21 + $0x80] sm:$0xff] }
  0xc5   : > { %v631_v27 = vsub.f32 %v1289_v2, %v622_v17  ;;  %1293 = vst [vmem:[%s2090_s11 + $0x60] sm:$0xff] %v622_v17  ;;  %v632_v31 = vsub.f32 %v1290_v9, %v623_v20  ;;  %1294 = vst [vmem:[%s2090_s11 + $0x68] sm:$0xff] %v623_v20  ;;  %v669_v34 = vadd.f32 %v665_v26, %v660_v13 }
  0xc6   : > { %v633_v32 = vsub.f32 %v1291_v11, %v624_v21  ;;  %1295 = vst [vmem:[%s2090_s11 + $0x70] sm:$0xff] %v624_v21  ;;  %v625_v33 = vadd.f32 %v621_v12, %v616_v22  ;;  %v666_v37 = vmul.f32 %v664_v14, %v2110_v18  ;;  %v675_v45 = vmul.f32 %v673_v16, %v2164_v6 }
  0xc7   : > { %v1389_v38 = vround.rtne.f32 %v631_v27  ;;  %v1390_v39 = vround.rtne.f32 %v632_v31  ;;  %v678_v43 = vadd.f32 %v674_v28, %v669_v34  ;;  %v684_v46 = vmul.f32 %v682_v29, %v2215_v57 }
  0xc8   : > { %v1391_v40 = vround.rtne.f32 %v633_v32  ;;  %v634_v41 = vsub.f32 %v1292_v25, %v625_v33  ;;  %1296 = vst [vmem:[%s2090_s11 + $0x78] sm:$0xff] %v625_v33  ;;  %v670_v44 = vadd.f32 %v666_v37, %v661_v36  ;;  %v662_v53 = vadd.f32 %v1303_v42, %v2225_v0 }
  0xc9   : > { %v2265_v47 = vadd.f32 %v1389_v38, %v622_v17  ;;  %v2267_v48 = vadd.f32 %v1390_v39, %v623_v20  ;;  %v687_v51 = vadd.f32 %v683_v35, %v678_v43  ;;  %v667_v54 = vmul.f32 %v664_v14, %v2112_v19  ;;  %v1310_v17 = vld [vmem:[%s2060_s21 + $0x88] sm:$0xff]  ;;  %v1317_v20 = vld [vmem:[%s2068_s5 + $0xa0] sm:$0xff] }
  0xca   : > { %v2269_v49 = vadd.f32 %v1391_v40, %v624_v21  ;;  %v1392_v50 = vround.rtne.f32 %v634_v41  ;;  %v679_v52 = vadd.f32 %v675_v45, %v670_v44  ;;  %v676_v63 = vmul.f32 %v673_v16, %v2166_v7  ;;  %v1318_v40 = vld [vmem:[%s2068_s5 + $0xa8] sm:$0xff] }
  0xcb   : > { %1297 = vst [vmem:[%s2120_s2 + $0x60] sm:$0xff] %v2265_v47  ;;  %1298 = vst [vmem:[%s2120_s2 + $0x68] sm:$0xff] %v2267_v48  ;;  %v692_v60 = vmul.f32 %v691_v30, %v2265_v47  ;;  %v693_v62 = vmul.f32 %v691_v30, %v2267_v48  ;;  %v671_v2 = vadd.f32 %v667_v54, %v662_v53  ;;  %v733_v27 = vstv %s2261_s16  ;;  %v1319_v53 = vld [vmem:[%s2068_s5 + $0xb0] sm:$0xff]  ;;  %s988_s16 = sshll.u32 %s2090_s11, 4  ;;  %s2448_s16 = int_to_ptr.vmem [resolvable:$true] %s988_s16 }
  0xcc   : > { %1299 = vst [vmem:[%s2120_s2 + $0x70] sm:$0xff] %v2269_v49  ;;  %v2284_v59 = vadd.f32 %v1392_v50, %v625_v33  ;;  %v688_v1 = vadd.f32 %v684_v46, %v679_v52  ;;  %v685_v3 = vmul.f32 %v682_v29, %v2217_v58  ;;  %v694_v4 = vmul.f32 %v691_v30, %v2269_v49  ;;  %v1312_v50 = vld [vmem:[%s2060_s21 + $0x98] sm:$0xff] }
  0xcd   : > { %v696_v9 = vadd.f32 %v692_v60, %v687_v51  ;;  %v663_v11 = vadd.f32 %v1304_v55, %v2225_v0  ;;  %v668_v12 = vmul.f32 %v664_v14, %v2117_v23  ;;  %v677_v13 = vmul.f32 %v673_v16, %v2170_v10 }
  0xce   : > { %1300 = vst [vmem:[%s2120_s2 + $0x78] sm:$0xff] %v2284_v59  ;;  %v697_v21 = vadd.f32 %v693_v62, %v688_v1  ;;  %v680_v22 = vadd.f32 %v676_v63, %v671_v2  ;;  %v686_v24 = vmul.f32 %v682_v29, %v2221_v61  ;;  %v695_v25 = vmul.f32 %v691_v30, %v2284_v59  ;;  %v1311_v29 = vld [vmem:[%s2060_s21 + $0x90] sm:$0xff] }
  0xcf   : > { %1305 = vst [vmem:[%s2090_s11 + $0x80] sm:$0xff] %v696_v9  ;;  %v672_v26 = vadd.f32 %v668_v12, %v663_v11  ;;  %v710_v28 = vsub.f32 %v1309_v8, %v696_v9  ;;  %v738_v0 = vstv %s2259_s9  ;;  %v734_v31 = vadd.f32 %v1317_v20, %v733_v27  ;;  %v1320_v12 = vld [vmem:[%s2068_s5 + $0xb8] sm:$0xff]  ;;  %s2381_s9 = sld [smem:[#allocation11 + $0x183]] }
  0xd0   : > { %1306 = vst [vmem:[%s2090_s11 + $0x88] sm:$0xff] %v697_v21  ;;  %v689_v14 = vadd.f32 %v685_v3, %v680_v22  ;;  %v711_v16 = vsub.f32 %v1310_v17, %v697_v21  ;;  %v739_v32 = vmul.f32 %v738_v0, %v2105_v15  ;;  %v747_v35 = vstv %s2271_s14 }
  0xd1   : > { %v681_v33 = vadd.f32 %v677_v13, %v672_v26  ;;  %v1393_v34 = vround.rtne.f32 %v710_v28  ;;  %v756_v30 = vstv %s2273_s15  ;;  %v748_v39 = vmul.f32 %v747_v35, %v2162_v5  ;;  %v1325_v28 = vld [vmem:[%s2060_s21 + $0xa0] sm:$0xff] }
  0xd2   : > { %v698_v36 = vadd.f32 %v694_v4, %v689_v14  ;;  %v1394_v37 = vround.rtne.f32 %v711_v16  ;;  %v743_v38 = vadd.f32 %v739_v32, %v734_v31  ;;  %v757_v43 = vmul.f32 %v756_v30, %v2213_v56 }
  0xd3   : > { %v690_v41 = vadd.f32 %v686_v24, %v681_v33  ;;  %v718_v42 = vadd.f32 %v1393_v34, %v696_v9  ;;  %v765_v44 = vstv %s2289_s17  ;;  %v735_v55 = vadd.f32 %v1318_v40, %v733_v27  ;;  %v1333_v33 = vld [vmem:[%s2068_s5 + $0xc0] sm:$0xff]  ;;  %v1326_v40 = vld [vmem:[%s2060_s21 + $0xa8] sm:$0xff] }
  0xd4   : > { %1307 = vst [vmem:[%s2090_s11 + $0x90] sm:$0xff] %v698_v36  ;;  %v719_v45 = vadd.f32 %v1394_v37, %v697_v21  ;;  %v712_v46 = vsub.f32 %v1311_v29, %v698_v36  ;;  %v752_v51 = vadd.f32 %v748_v39, %v743_v38  ;;  %v766_v52 = vmul.f32 %v765_v44, %v2265_v47 }
  0xd5   : > { %v699_v54 = vadd.f32 %v695_v25, %v690_v41  ;;  %1313 = vst [vmem:[%s2120_s2 + $0x80] sm:$0xff] %v718_v42  ;;  %v740_v60 = vmul.f32 %v738_v0, %v2110_v18  ;;  %v749_v62 = vmul.f32 %v747_v35, %v2164_v6  ;;  %v758_v2 = vmul.f32 %v756_v30, %v2215_v57 }
  0xd6   : > { %1314 = vst [vmem:[%s2120_s2 + $0x88] sm:$0xff] %v719_v45  ;;  %v1395_v63 = vround.rtne.f32 %v712_v46  ;;  %v761_v1 = vadd.f32 %v757_v43, %v752_v51  ;;  %v767_v3 = vmul.f32 %v765_v44, %v2267_v48  ;;  %v736_v9 = vadd.f32 %v1319_v53, %v733_v27  ;;  %v1327_v46 = vld [vmem:[%s2060_s21 + $0xb0] sm:$0xff] }
  0xd7   : > { %1308 = vst [vmem:[%s2090_s11 + $0x98] sm:$0xff] %v699_v54  ;;  %v713_v4 = vsub.f32 %v1312_v50, %v699_v54  ;;  %v744_v8 = vadd.f32 %v740_v60, %v735_v55  ;;  %v741_v11 = vmul.f32 %v738_v0, %v2112_v19  ;;  %v750_v20 = vmul.f32 %v747_v35, %v2166_v7  ;;  %v1334_v55 = vld [vmem:[%s2068_s5 + $0xc8] sm:$0xff] }
  0xd8   : > { %v720_v13 = vadd.f32 %v1395_v63, %v698_v36  ;;  %v770_v17 = vadd.f32 %v766_v52, %v761_v1  ;;  %v759_v21 = vmul.f32 %v756_v30, %v2217_v58  ;;  %v768_v26 = vmul.f32 %v765_v44, %v2269_v49 }
  0xd9   : > { %v1396_v22 = vround.rtne.f32 %v713_v4  ;;  %v753_v24 = vadd.f32 %v749_v62, %v744_v8  ;;  %v745_v25 = vadd.f32 %v741_v11, %v736_v9  ;;  %v737_v14 = vadd.f32 %v1320_v12, %v733_v27  ;;  %v1328_v4 = vld [vmem:[%s2060_s21 + $0xb8] sm:$0xff]  ;;  %v1335_v11 = vld [vmem:[%s2068_s5 + $0xd0] sm:$0xff] }
  0xda   : > { %1315 = vst [vmem:[%s2120_s2 + $0x90] sm:$0xff] %v720_v13  ;;  %1321 = vst [vmem:[%s2090_s11 + $0xa0] sm:$0xff] %v770_v17  ;;  %v742_v16 = vmul.f32 %v738_v0, %v2117_v23  ;;  %v751_v31 = vmul.f32 %v747_v35, %v2170_v10  ;;  %v760_v32 = vmul.f32 %v756_v30, %v2221_v61  ;;  %v807_v27 = vstv %s2321_s22  ;;  %s1646_s22 = scalar_lea.vmem %s2448_s16, 4096 }
  0xdb   : > { %v721_v34 = vadd.f32 %v1396_v22, %v699_v54  ;;  %v762_v29 = vadd.f32 %v758_v2, %v753_v24  ;;  %v754_v36 = vadd.f32 %v750_v20, %v745_v25  ;;  %v769_v37 = vmul.f32 %v765_v44, %v2284_v59  ;;  %p1647_p10 = scmp.ne.s32.totalorder %s2448_s16, %s1646_s22 }
  0xdc   : > { %v746_v38 = vadd.f32 %v742_v16, %v737_v14  ;;  %v784_v39 = vsub.f32 %v1325_v28, %v770_v17  ;;  %v812_v41 = vstv %s2319_s8  ;;  %v808_v30 = vadd.f32 %v1333_v33, %v807_v27  ;;  %s955_s8 = scalar_lea.sflag [#allocation16], %s2053_s23 }
  0xdd   : > { %1316 = vst [vmem:[%s2120_s2 + $0x98] sm:$0xff] %v721_v34  ;;  %v771_v0 = vadd.f32 %v767_v3, %v762_v29  ;;  %v763_v35 = vadd.f32 %v759_v21, %v754_v36  ;;  %v813_v42 = vmul.f32 %v812_v41, %v2105_v15  ;;  %v821_v44 = vstv %s2329_s0  ;;  %p1648_p0 = pnand %p1647_p10, %p1948_p5  ;;  %s1786_s0 = smov [#allocation15]  }
  0xde   : > { %v755_v43 = vadd.f32 %v751_v31, %v746_v38  ;;  %v1397_v45 = vround.rtne.f32 %v784_v39  ;;  %v830_v50 = vstv %s2331_s3  ;;  %v822_v54 = vmul.f32 %v821_v44, %v2162_v5  ;;  %v1336_v31 = vld [vmem:[%s2068_s5 + $0xd8] sm:$0xff]  ;;  %s1650_s3 = sshll.u32 %s1786_s0, 4  ;;  %s1651_s3 = int_to_ptr.vmem [resolvable:$false] %s1650_s3 }
  0xdf   : > { %1322 = vst [vmem:[%s2090_s11 + $0xa8] sm:$0xff] %v771_v0  ;;  %v772_v51 = vadd.f32 %v768_v26, %v763_v35  ;;  %v785_v52 = vsub.f32 %v1326_v40, %v771_v0  ;;  %v817_v53 = vadd.f32 %v813_v42, %v808_v30  ;;  %v831_v63 = vmul.f32 %v830_v50, %v2213_v56  ;;  %v1341_v40 = vld [vmem:[%s2060_s21 + $0xc0] sm:$0xff]  ;;  %p1649_p1 = pneg %p1648_p0  ;;  %p1653_p13 = scmp.lt.s32.totalorder %s2448_s16, %s1651_s3 }
  0xe0   : > { %v764_v60 = vadd.f32 %v760_v32, %v755_v43  ;;  %v792_v62 = vadd.f32 %v1397_v45, %v770_v17  ;;  %v839_v1 = vstv %s2338_s19  ;;  %v809_v13 = vadd.f32 %v1334_v55, %v807_v27  ;;  %v1349_v43 = vld [vmem:[%s2068_s5 + $0xe0] sm:$0xff]  ;;  %s1652_s19 = scalar_lea.vmem %s1651_s3, 8192 }
  0xe1   : > { %1323 = vst [vmem:[%s2090_s11 + $0xb0] sm:$0xff] %v772_v51  ;;  %v1398_v2 = vround.rtne.f32 %v785_v52  ;;  %v786_v3 = vsub.f32 %v1327_v46, %v772_v51  ;;  %v826_v8 = vadd.f32 %v822_v54, %v817_v53  ;;  %v840_v9 = vmul.f32 %v839_v1, %v2265_v47  ;;  %p1654_p2 = scmp.lt.s32.totalorder %s1652_s19, %s1646_s22 }
  0xe2   : > { %v773_v12 = vadd.f32 %v769_v37, %v764_v60  ;;  %1329 = vst [vmem:[%s2120_s2 + $0xa0] sm:$0xff] %v792_v62  ;;  %v814_v17 = vmul.f32 %v812_v41, %v2110_v18  ;;  %v823_v20 = vmul.f32 %v821_v44, %v2164_v6  ;;  %v832_v25 = vmul.f32 %v830_v50, %v2215_v57 }
  0xe3   : > { %v793_v21 = vadd.f32 %v1398_v2, %v771_v0  ;;  %v1399_v22 = vround.rtne.f32 %v786_v3  ;;  %v835_v24 = vadd.f32 %v831_v63, %v826_v8  ;;  %v841_v14 = vmul.f32 %v839_v1, %v2267_v48  ;;  %p1655_p6 = por %p1654_p2, %p1653_p13 }
  0xe4   : > { %1324 = vst [vmem:[%s2090_s11 + $0xb8] sm:$0xff] %v773_v12  ;;  %v787_v26 = vsub.f32 %v1328_v4, %v773_v12  ;;  %v818_v28 = vadd.f32 %v814_v17, %v809_v13  ;;  %v810_v16 = vadd.f32 %v1335_v11, %v807_v27  ;;  %v815_v34 = vmul.f32 %v812_v41, %v2112_v19  ;;  %v1350_v4 = vld [vmem:[%s2068_s5 + $0xe8] sm:$0xff] }
  0xe5   : > { %1330 = vst [vmem:[%s2120_s2 + $0xa8] sm:$0xff] %v793_v21  ;;  %v794_v32 = vadd.f32 %v1399_v22, %v772_v51  ;;  %v844_v33 = vadd.f32 %v840_v9, %v835_v24  ;;  %v824_v29 = vmul.f32 %v821_v44, %v2166_v7  ;;  %v833_v38 = vmul.f32 %v830_v50, %v2217_v58  ;;  %v1343_v9 = vld [vmem:[%s2060_s21 + $0xd0] sm:$0xff]  ;;  %p1656_p4 = pnand %p1655_p6, %p1649_p1 }
  0xe6   : > { %v1400_v36 = vround.rtne.f32 %v787_v26  ;;  %v827_v37 = vadd.f32 %v823_v20, %v818_v28  ;;  %v842_v39 = vmul.f32 %v839_v1, %v2269_v49  ;;  %v819_v0 = vadd.f32 %v815_v34, %v810_v16 }
  0xe7   : > { %1331 = vst [vmem:[%s2120_s2 + $0xb0] sm:$0xff] %v794_v32  ;;  %1337 = vst [vmem:[%s2090_s11 + $0xc0] sm:$0xff] %v844_v33  ;;  %v811_v35 = vadd.f32 %v1336_v31, %v807_v27  ;;  %v816_v30 = vmul.f32 %v812_v41, %v2117_v23  ;;  %v825_v42 = vmul.f32 %v821_v44, %v2170_v10  ;;  %v1342_v27 = vld [vmem:[%s2060_s21 + $0xc8] sm:$0xff]  ;;  %v881_v60 = vstv %s2366_s10 }
  0xe8   : > { %v795_v45 = vadd.f32 %v1400_v36, %v773_v12  ;;  %v836_v46 = vadd.f32 %v832_v25, %v827_v37  ;;  %v834_v51 = vmul.f32 %v830_v50, %v2221_v61  ;;  %v843_v52 = vmul.f32 %v839_v1, %v2284_v59  ;;  %v1344_v25 = vld [vmem:[%s2060_s21 + $0xd8] sm:$0xff]  ;;  %v1351_v32 = vld [vmem:[%s2068_s5 + $0xf0] sm:$0xff] }
  0xe9   : > { %v828_v53 = vadd.f32 %v824_v29, %v819_v0  ;;  %v820_v54 = vadd.f32 %v816_v30, %v811_v35  ;;  %v858_v55 = vsub.f32 %v1341_v40, %v844_v33  ;;  %v882_v44 = vadd.f32 %v1349_v43, %v881_v60 }
  0xea   : > { %1332 = vst [vmem:[%s2120_s2 + $0xb8] sm:$0xff] %v795_v45  ;;  %v845_v41 = vadd.f32 %v841_v14, %v836_v46  ;;  %v886_v62 = vstv %s2371_s30  ;;  %v895_v63 = vstv %s2373_s13  ;;  %v904_v12 = vstv %s2379_s4 }
  0xeb   : > { %v837_v2 = vadd.f32 %v833_v38, %v828_v53  ;;  %v829_v50 = vadd.f32 %v825_v42, %v820_v54  ;;  %v1401_v3 = vround.rtne.f32 %v858_v55  ;;  %v887_v1 = vmul.f32 %v886_v62, %v2105_v15  ;;  %v1352_v38 = vld [vmem:[%s2068_s5 + $0xf8] sm:$0xff]  ;;  %v1357_v42 = vld [vmem:[%s2060_s21 + $0xe0] sm:$0xff]  ;;  %s1375_s5 = sshll.u32 %s1768_s27, 12 }
  0xec   : > { %1338 = vst [vmem:[%s2090_s11 + $0xc8] sm:$0xff] %v845_v41  ;;  %v859_v8 = vsub.f32 %v1342_v27, %v845_v41  ;;  %v896_v11 = vmul.f32 %v895_v63, %v2162_v5  ;;  %v913_v13 = vstv %s2381_s9  ;;  %v905_v15 = vmul.f32 %v904_v12, %v2213_v56  ;;  %v1358_v27 = vld [vmem:[%s2060_s21 + $0xe8] sm:$0xff]  ;;  %s2446_s17 = scalar_lea.hbm %s2550_s7, %s1375_s5 }
  0xed   : > { %v846_v17 = vadd.f32 %v842_v39, %v837_v2  ;;  %v838_v20 = vadd.f32 %v834_v51, %v829_v50  ;;  %v866_v21 = vadd.f32 %v1401_v3, %v844_v33  ;;  %v891_v22 = vadd.f32 %v887_v1, %v882_v44  ;;  %v1360_v3 = vld [vmem:[%s2060_s21 + $0xf8] sm:$0xff] }
  0xee   : > { %v1402_v24 = vround.rtne.f32 %v859_v8  ;;  %v914_v26 = vmul.f32 %v913_v13, %v2265_v47  ;;  %v883_v28 = vadd.f32 %v1350_v4, %v881_v60  ;;  %v888_v31 = vmul.f32 %v886_v62, %v2110_v18 }
  0xef   : > { %1339 = vst [vmem:[%s2090_s11 + $0xd0] sm:$0xff] %v846_v17  ;;  %v847_v14 = vadd.f32 %v843_v52, %v838_v20  ;;  %1345 = vst [vmem:[%s2120_s2 + $0xc0] sm:$0xff] %v866_v21  ;;  %v860_v5 = vsub.f32 %v1343_v9, %v846_v17  ;;  %v900_v16 = vadd.f32 %v896_v11, %v891_v22 }
  0xf0   : > { %v867_v33 = vadd.f32 %v1402_v24, %v845_v41  ;;  %v897_v34 = vmul.f32 %v895_v63, %v2164_v6  ;;  %v906_v29 = vmul.f32 %v904_v12, %v2215_v57  ;;  %v892_v37 = vadd.f32 %v888_v31, %v883_v28 }
  0xf1   : > { %1340 = vst [vmem:[%s2090_s11 + $0xd8] sm:$0xff] %v847_v14  ;;  %v1403_v56 = vround.rtne.f32 %v860_v5  ;;  %v861_v47 = vsub.f32 %v1344_v25, %v847_v14  ;;  %v909_v36 = vadd.f32 %v905_v15, %v900_v16  ;;  %v915_v39 = vmul.f32 %v913_v13, %v2267_v48 }
  0xf2   : > { %1346 = vst [vmem:[%s2120_s2 + $0xc8] sm:$0xff] %v867_v33  ;;  %v884_v40 = vadd.f32 %v1351_v32, %v881_v60  ;;  %v889_v18 = vmul.f32 %v886_v62, %v2112_v19  ;;  %v898_v0 = vmul.f32 %v895_v63, %v2166_v7  ;;  %v901_v30 = vadd.f32 %v897_v34, %v892_v37 }
  0xf3   : > { %v868_v6 = vadd.f32 %v1403_v56, %v846_v17  ;;  %v1404_v35 = vround.rtne.f32 %v861_v47  ;;  %v918_v57 = vadd.f32 %v914_v26, %v909_v36  ;;  %v907_v45 = vmul.f32 %v904_v12, %v2217_v58 }
  0xf4   : > { %v893_v43 = vadd.f32 %v889_v18, %v884_v40  ;;  %v885_v46 = vadd.f32 %v1352_v38, %v881_v60  ;;  %v890_v51 = vmul.f32 %v886_v62, %v2117_v23  ;;  %v910_v19 = vadd.f32 %v906_v29, %v901_v30  ;;  %v1359_v62 = vld [vmem:[%s2060_s21 + $0xf0] sm:$0xff]  ;;  %s970_s21 = sshll.u32 %s2120_s2, 4  ;;  %s2490_s21 = int_to_ptr.vmem [resolvable:$true] %s970_s21 }
  0xf5   : > { %1347 = vst [vmem:[%s2120_s2 + $0xd0] sm:$0xff] %v868_v6  ;;  %v869_v48 = vadd.f32 %v1404_v35, %v847_v14  ;;  %1353 = vst [vmem:[%s2090_s11 + $0xe0] sm:$0xff] %v918_v57  ;;  %v916_v7 = vmul.f32 %v913_v13, %v2269_v49  ;;  %v899_v52 = vmul.f32 %v895_v63, %v2170_v10 }
  0xf6   : > { %v902_v53 = vadd.f32 %v898_v0, %v893_v43  ;;  %v894_v54 = vadd.f32 %v890_v51, %v885_v46  ;;  %v908_v55 = vmul.f32 %v904_v12, %v2221_v61  ;;  %v932_v58 = vsub.f32 %v1357_v42, %v918_v57 }
  0xf7   : > { %1348 = vst [vmem:[%s2120_s2 + $0xd8] sm:$0xff] %v869_v48  ;;  %v919_v23 = vadd.f32 %v915_v39, %v910_v19  ;;  %v917_v44 = vmul.f32 %v913_v13, %v2284_v59 }
  0xf8   : > { %v911_v60 = vadd.f32 %v907_v45, %v902_v53  ;;  %v903_v41 = vadd.f32 %v899_v52, %v894_v54  ;;  %v1405_v49 = vround.rtne.f32 %v932_v58 }
  0xf9   : > { %1354 = vst [vmem:[%s2090_s11 + $0xe8] sm:$0xff] %v919_v23  ;;  %v933_v10 = vsub.f32 %v1358_v27, %v919_v23 }
  0xfa   : > { %v920_v61 = vadd.f32 %v916_v7, %v911_v60  ;;  %v912_v63 = vadd.f32 %v908_v55, %v903_v41  ;;  %v940_v2 = vadd.f32 %v1405_v49, %v918_v57 }
  0xfb   : > { %v1406_v50 = vround.rtne.f32 %v933_v10 }
  0xfc   : > { %1355 = vst [vmem:[%s2090_s11 + $0xf0] sm:$0xff] %v920_v61  ;;  %v921_v1 = vadd.f32 %v917_v44, %v912_v63  ;;  %1361 = vst [vmem:[%s2120_s2 + $0xe0] sm:$0xff] %v940_v2  ;;  %v934_v59 = vsub.f32 %v1359_v62, %v920_v61 }
  0xfd   : > { %v941_v4 = vadd.f32 %v1406_v50, %v919_v23 }
  0xfe   : > { %1356 = vst [vmem:[%s2090_s11 + $0xf8] sm:$0xff] %v921_v1  ;;  %v1407_v8 = vround.rtne.f32 %v934_v59  ;;  %v935_v9 = vsub.f32 %v1360_v3, %v921_v1 }
  0xff   : > { %1362 = vst [vmem:[%s2120_s2 + $0xe8] sm:$0xff] %v941_v4 }
 0x100   : > { %1659 = shalt.err (!%p1656_p4)
}
 0x101   : > { %s1660_s11 = scalar_lea.hbm %s2446_s17, 4096  ;;  %s1664_s13 = scalar_lea.hbm %s2550_s7, 8192 }
 0x102   : > { %p1661_p9 = scmp.ne.s32.totalorder %s2446_s17, %s1660_s11  ;;  %p1665_p12 = scmp.lt.u32.totalorder %s2446_s17, %s2550_s7 }
 0x103   : > { %p1666_p8 = scmp.lt.u32.totalorder %s1664_s13, %s1660_s11  ;;  %p1668_p10 = scmp.lt.u32.totalorder %s1660_s11, %s2446_s17 }
 0x104   : > { %p1662_p3 = pnand %p1661_p9, %p1948_p5 }
 0x105   : > { %p1667_p7 = por %p1666_p8, %p1665_p12 }
 0x106   : > { %p1663_p11 = pneg %p1662_p3 }
 0x107   : > { %p1669_p0 = por %p1668_p10, %p1667_p7 }
 0x109   : > { %p1670_p1 = pnand %p1669_p0, %p1663_p11 }
 0x10b   : > { %1673 = shalt.err (!%p1670_p1)
}
 0x10c   : > { %s1787_s14 = smov 128   ;;  %s1788_s15 = smov 8   ;;  %v942_v11 = vadd.f32 %v1407_v8, %v920_v61  ;;  %v1408_v12 = vround.rtne.f32 %v935_v9 }
 0x10d   : > { %1430 = dma.vmem_to_hbm [thread:$0]  (%p1948_p5), %s2448_s16, 4096, %s2446_s17, %s955_s8, %s1787_s14, %s1787_s14, %s1788_s15  }
 0x10e   : > { %1363 = vst [vmem:[%s2120_s2 + $0xf0] sm:$0xff] %v942_v11  ;;  %v943_v13 = vadd.f32 %v1408_v12, %v921_v1  ;;  %s2486_s3 = scalar_lea.hbm %s2549_s6, %s1375_s5  ;;  %s950_s19 = scalar_lea.sflag [#allocation4], %s2053_s23 }
 0x10f   : > { %s1674_s11 = scalar_lea.vmem %s2490_s21, 4096  ;;  %s1789_s16 = smov [#allocation14]  }
 0x110   : > { %1364 = vst [vmem:[%s2120_s2 + $0xf8] sm:$0xff] %v943_v13  ;;  %p1675_p13 = scmp.ne.s32.totalorder %s2490_s21, %s1674_s11  ;;  %s1678_s27 = sshll.u32 %s1789_s16, 4  ;;  %s1679_s27 = int_to_ptr.vmem [resolvable:$false] %s1678_s27 }
 0x111   : > { %s1680_s17 = scalar_lea.vmem %s1679_s27, 8192  ;;  %p1681_p4 = scmp.lt.s32.totalorder %s2490_s21, %s1679_s27 }
 0x112   : > { %p1676_p2 = pnand %p1675_p13, %p1948_p5  ;;  %p1682_p9 = scmp.lt.s32.totalorder %s1680_s17, %s1674_s11 }
 0x114   : > { %p1677_p6 = pneg %p1676_p2  ;;  %p1683_p3 = por %p1682_p9, %p1681_p4 }
 0x116   : > { %p1684_p11 = pnand %p1683_p3, %p1677_p6 }
 0x118   : > { %1687 = shalt.err (!%p1684_p11)
}
 0x119   : > { %s1688_s2 = scalar_lea.hbm %s2486_s3, 4096  ;;  %s1692_s10 = scalar_lea.hbm %s2549_s6, 8192 }
 0x11a   : > { %p1689_p12 = scmp.ne.s32.totalorder %s2486_s3, %s1688_s2  ;;  %p1693_p10 = scmp.lt.u32.totalorder %s2486_s3, %s2549_s6 }
 0x11b   : > { %p1694_p0 = scmp.lt.u32.totalorder %s1692_s10, %s1688_s2  ;;  %p1696_p13 = scmp.lt.u32.totalorder %s1688_s2, %s2486_s3 }
 0x11c   : > { %p1690_p8 = pnand %p1689_p12, %p1948_p5 }
 0x11d   : > { %p1695_p1 = por %p1694_p0, %p1693_p10 }
 0x11e   : > { %p1691_p7 = pneg %p1690_p8 }
 0x11f   : > { %p1697_p2 = por %p1696_p13, %p1695_p1 }
 0x121   : > { %p1698_p6 = pnand %p1697_p2, %p1691_p7 }
 0x123   : > { %1701 = shalt.err (!%p1698_p6)
}
 0x124   : > { %1429 = dma.vmem_to_hbm [thread:$0]  (%p1948_p5), %s2490_s21, 4096, %s2486_s3, %s950_s19, %s1787_s14, %s1787_s14, %s1788_s15  }
 0x125 PF: > { %s1003_s4 = sand.u32 1, %s1756_s24   ;;  %p2584_p4 = scmp.ne.s32.totalorder %s2566_s12, 0 }
 0x126   : > { %p2585_p9 = scmp.ge.s32.totalorder %s1776_s29, 2  ;;  %s1004_s9 = scalar_lea.sflag [#allocation4], %s1003_s4 }
 0x128   : > { %p1454_p3 = pnand %p2585_p9, %p2584_p4 }
 0x12a   : > { %1747 = dma.done.wait (!%p1454_p3), %s1004_s9, 4096  }
 0x12b   : > { %1749 = vsyncadd (!%p1454_p3), %s1004_s9, 4294963200  ;;  %s1013_s20 = scalar_lea.sflag [#allocation16], %s1003_s4 }
 0x12c   : > { %1751 = dma.done.wait (!%p1454_p3), %s1013_s20, 4096  }
 0x12d   : > { %1753 = vsyncadd (!%p1454_p3), %s1013_s20, 4294963200  ;;  %s33_s29 = sadd.s32 1, %s1776_s29   ;;  %s2586_s23 = sld [smem:[#allocation24_spill]] }
 0x12e   : > { %p30_p11 = scmp.ge.s32.totalorder %s33_s29, 4   ;;  %s2587_s24 = smov %s1760_s25 }
 0x12f   : > { %s2588_s25 = smov %s1764_s26  ;;  %s2589_s26 = smov %s1960_s18 }
 0x130   : > { %s2590_s27 = smov %s1772_s28  ;;  %32 = sbr.rel (!%p30_p11) target bundleno = 19 (0x13), region = 164 }
 0x133   : > { %s2591_s28 = smov %s2586_s23 }
 0x137   :  { %1018 = vsyncpa [#allocation3], 1 }
 0x138   :  { %1020 = vsyncpa [#allocation3 + $0x1], 1 }
 0x139   :  { %1021 = vsyncpa [#allocation7], 1 }
 0x13a   :  { %1023 = vsyncpa [#allocation7 + $0x1], 1 }
 0x13b   :  { %1024 = vsyncpa [#allocation4], 1 }
 0x13c   :  { %1026 = vsyncpa [#allocation4 + $0x1], 1 }
 0x13d   :  { %1027 = vsyncpa [#allocation16], 1 }
 0x13e   :  { %1029 = vsyncpa [#allocation16 + $0x1], 1 }
 0x13f   :  { %1030 = vsyncpa [#allocation5], 1 }
 0x140   :  { %1032 = vsyncpa [#allocation5 + $0x1], 1 }
 0x141   :  { %1033 = vsyncpa [#allocation10], 1 }
 0x142   :  { %1034 = vsyncpa [#allocation13], 1 }

</bundles_post_ra>
